<compile_context>
chip_gen: v7x
topology: tpu7x:2x2x1
jax: 0.10.0
libtpu: 0.0.40
codegen_flags: <defaults>
</compile_context>

<pallas_src>
import numpy as np
import jax
import jax.numpy as jnp
from jax import lax
from jax.experimental import pallas as pl
from jax.experimental.pallas import tpu as pltpu


# ----------------------------------------------------------------------------
# host-side packing helper
# ----------------------------------------------------------------------------
def _pack_rows(blocks, width, dtype=np.float32):
    """Stack 2-D blocks along rows at 8-aligned offsets, right-pad to `width`.

    Returns (slab jnp.ndarray [R, width], {name: (row_off, nrows, ncols)}).
    """
    offs, chunks, cur = {}, [], 0
    for name, arr in blocks:
        arr = np.asarray(arr, dtype)
        r, c = arr.shape
        rp = ((r + 7) // 8) * 8
        buf = np.zeros((rp, width), dtype)
        buf[:r, :c] = arr
        offs[name] = (cur, r, c)
        chunks.append(buf)
        cur += rp
    return jnp.asarray(np.concatenate(chunks, axis=0)), offs


# ----------------------------------------------------------------------------
# fused Pallas kernel
# ----------------------------------------------------------------------------
def _make_gain_kernel(dims, offs32, offsW, act="relu", mxu_bf16=True):
    BS = dims["BS"]
    EMB_ROWS = dims["EMB_ROWS"]
    D = dims["GCN_DIM"]
    N = dims["N_TOTAL"]
    E = dims["E_TOTAL"]
    BL = dims["BL"]
    L = dims["GCN_LAYERS"]
    R = dims["NUM_REL"]
    REL_OFF = dims["REL_OFF"]
    DST_OFF = dims["DST_OFF"]

    if act == "relu":
        actf = lambda x: jnp.maximum(x, 0.0)
    elif act == "tanh":
        actf = jnp.tanh
    else:
        raise ValueError("you should provide activation function.")

    mm_dtype = jnp.bfloat16 if mxu_bf16 else jnp.float32

    def dot(a, b):
        # MXU matmul: bf16 inputs (0/1 selects stay exact), f32 accumulation.
        return jnp.dot(a.astype(mm_dtype), b.astype(mm_dtype),
                       preferred_element_type=jnp.float32)

    def kernel(ids_ref, s32_ref, sW_ref, out_ref):
        def b32(name):
            o, r, c = offs32[name]
            return s32_ref[o:o + r, 0:c]

        def bW(name):
            o, r, c = offsW[name]
            return sW_ref[o:o + r, 0:c]

        # --- embeddings: concat(tok_emb[words], type_emb[t], id_emb[e]) as ONE
        #     multi-hot matmul (the three tables occupy disjoint column blocks).
        ids = ids_ref[...]                                              # [B*S, 3]
        iota = lax.broadcasted_iota(jnp.int32, (BS, EMB_ROWS), 1)
        multihot = ((ids[:, 0:1] == iota) | (ids[:, 1:2] == iota)
                    | (ids[:, 2:3] == iota)).astype(jnp.float32)
        raw = dot(multihot, b32("emb"))                                 # [B*S, D]

        # --- stand-in encoder projection; type/id concat == masked add --------
        enc = jnp.tanh(dot(raw, b32("wenc")) + b32("benc"))             # [B*S, D]
        enc_out = enc + raw * b32("extmask")

        # --- pooler on the B CLS rows only (gather -> tanh(linear) -> scatter) -
        cls_rows = dot(b32("clsg"), enc)                                # [B, D]
        sent_cls = jnp.tanh(dot(cls_rows, b32("wpool")) + b32("bpool"))

        # --- mention pooling (block-diag, host-normalised select) --------------
        feat = dot(b32("selm"), enc_out) + dot(b32("clssc"), sent_cls)  # [N, D]

        # --- R-GCN layers: stacked relation messages + one K=4D matmul ---------
        feats = [feat]
        for l in range(L):
            msgs = dot(b32("astack"), feat)                             # [R*16, D]
            stacked = jnp.concatenate(
                [feat] + [msgs[r * REL_OFF:r * REL_OFF + N] for r in range(R)],
                axis=-1)                                                # [N, 4D]
            feat = actf(dot(stacked, b32(f"wg{l}")) + b32(f"gb{l}"))
            feats.append(feat)
        of = jnp.concatenate(feats, axis=-1)                            # [N, BANK]

        # --- entity pooling + head / tail / global gathers ----------------------
        reps = dot(b32("sele2m"), of)                                   # [NE, BANK]
        hg = dot(b32("hgt"), reps)                                      # [3*BL, BANK]
        h_e, t_e, g_e = hg[0:BL], hg[BL:2 * BL], hg[2 * BL:3 * BL]

        # --- RelEdgeLayer over the complete per-doc entity digraphs -------------
        egf = reps[:, L * D:(L + 1) * D]                                # last D slice
        ed = dot(b32("edgesel"), egf)
        src_f, dst_f = ed[0:E], ed[DST_OFF:DST_OFF + E]
        edge_h = actf(dot(jnp.concatenate([src_f, dst_f], axis=-1),
                          b32("wedge")) + b32("bedge"))                 # [E, D]

        # --- path aggregation (softmax over a size-1 axis == plain sum) ---------
        pp = dot(b32("ppath"), edge_h)                                  # [4*BL, D]
        path_cat = jnp.concatenate(
            [pp[k * BL:(k + 1) * BL] for k in range(4)], axis=-1)       # [BL, 4D]
        path_info = actf(dot(path_cat, bW("wpath")) + bW("bpath"))

        # --- prediction head: single K=608 matmul --------------------------------
        pred_in = jnp.concatenate(
            [h_e, t_e, jnp.abs(h_e - t_e), h_e * t_e, g_e, path_info], axis=-1)
        hid = actf(dot(pred_in, bW("wp1")) + bW("bp1"))
        out_ref[...] = dot(hid, bW("wp2")) + bW("bp2")                  # [BL, 128]

    return kernel


def build_gain_forward(dims, offs32, offsW, slab32, slabW, *, act="relu",
                       mxu_bf16=True):
    kernel = _make_gain_kernel(dims, offs32, offsW, act=act, mxu_bf16=mxu_bf16)
    vmem = lambda: pl.BlockSpec(memory_space=pltpu.MemorySpace.VMEM)
    call = pl.pallas_call(
        kernel,
        out_shape=jax.ShapeDtypeStruct((dims["BL"], dims["OUT_PAD"]), jnp.float32),
        in_specs=[vmem(), vmem(), vmem()],
        out_specs=vmem(),
    )

    def fwd(ids):
        return call(ids, slab32, slabW)

    return fwd


# ----------------------------------------------------------------------------
# main
# ----------------------------------------------------------------------------
if __name__ == "__main__":
    # ---------------- config (small, consistent with the module) -------------
    BSZ, SLEN = 2, 16
    VOCAB = 30
    BERT_HID = 24
    ENT_TYPE_NUM, ENT_TYPE_SIZE = 5, 4
    MAX_ENT_NUM, ENT_ID_SIZE = 6, 4
    GCN_DIM = BERT_HID + ENT_TYPE_SIZE + ENT_ID_SIZE      # 32
    GCN_LAYERS = 2
    BANK = GCN_DIM * (GCN_LAYERS + 1)                     # 96
    NUM_REL = 3                                           # intra / inter / global
    RELATION_NUMS = 8
    H_T_LIMIT = 4
    ACT = "relu"                                          # config.activation
    BL = BSZ * H_T_LIMIT
    BS = BSZ * SLEN
    EMB_ROWS = VOCAB + ENT_TYPE_NUM + (MAX_ENT_NUM + 1)   # 42
    OUT_PAD = 128

    # ---------------- deterministic parameter init ---------------------------
    keys = iter(jax.random.split(jax.random.PRNGKey(0), 64))

    def rnd(shape, scale=0.1):
        return np.asarray(jax.random.normal(next(keys), shape,
                                            dtype=jnp.float32)) * scale

    # TODO(synk): BertModel.from_pretrained cannot be loaded here; a deterministic
    # token-embedding + tanh projection (+ tanh CLS pooler) stands in for BERT.
    tok_emb = rnd((VOCAB, BERT_HID))
    W_enc = rnd((BERT_HID, BERT_HID)); b_enc = np.zeros((BERT_HID,), np.float32)
    W_pool = rnd((BERT_HID, BERT_HID)); b_pool = np.zeros((BERT_HID,), np.float32)

    type_emb = rnd((ENT_TYPE_NUM, ENT_TYPE_SIZE)); type_emb[0] = 0.0   # padding_idx
    id_emb = rnd((MAX_ENT_NUM + 1, ENT_ID_SIZE)); id_emb[0] = 0.0      # padding_idx

    gcn_w = [rnd((NUM_REL, GCN_DIM, GCN_DIM)) for _ in range(GCN_LAYERS)]
    gcn_loop = [rnd((GCN_DIM, GCN_DIM)) for _ in range(GCN_LAYERS)]
    gcn_b = [np.zeros((GCN_DIM,), np.float32) for _ in range(GCN_LAYERS)]

    W_edge = rnd((GCN_DIM * 2, GCN_DIM)); b_edge = rnd((GCN_DIM,), 0.01)
    W_path = rnd((GCN_DIM * 4, GCN_DIM * 4)); b_path = rnd((GCN_DIM * 4,), 0.01)

    PRED_IN = BANK * 5 + GCN_DIM * 4                                   # 608
    W_p1 = rnd((PRED_IN, BANK * 2)); b_p1 = rnd((BANK * 2,), 0.01)
    W_p2 = rnd((BANK * 2, RELATION_NUMS)); b_p2 = rnd((RELATION_NUMS,), 0.01)

    # ---------------- deterministic synthetic inputs -------------------------
    words = jax.random.randint(next(keys), (BSZ, SLEN), 0, VOCAB, dtype=jnp.int32)
    mask = jnp.ones((BSZ, SLEN), jnp.int32)   # TODO(synk): attention mask unused by stand-in encoder
    entity_type = jax.random.randint(next(keys), (BSZ, SLEN), 0, ENT_TYPE_NUM,
                                     dtype=jnp.int32)

    mention_id_np = np.array(
        [[0, 1, 1, 2, 2, 0, 3, 3, 0, 4, 4, 0, 0, 0, 0, 0],
         [0, 1, 0, 2, 2, 0, 3, 0, 4, 4, 4, 0, 0, 0, 0, 0]], dtype=np.int64)
    m2e = np.array([0, 1, 1, 2, 3])          # mentions {1,2}->ent1, {3}->ent2, {4}->ent3
    entity_id_np = m2e[mention_id_np]
    entity_id = jnp.asarray(entity_id_np, jnp.int32)

    e2m_table = []                            # [entity_num+1, mention_num+1] per doc
    for _ in range(BSZ):
        t = np.zeros((4, 5), np.float32)
        t[1, 1] = t[1, 2] = 1.0
        t[2, 3] = 1.0
        t[3, 4] = 1.0
        e2m_table.append(t)

    h_t_pairs_np = np.array(
        [[[1, 2], [2, 3], [1, 3], [3, 1]],
         [[1, 2], [2, 3], [0, 0], [0, 0]]], dtype=np.int64)
    relation_mask_np = np.array([[1, 1, 1, 1], [1, 1, 0, 0]], dtype=np.int64)
    path_table = [
        {(1, 2): [3], (2, 3): [1], (1, 3): [2], (3, 1): [2]},
        {(1, 2): [3], (2, 3): [1]},
    ]

    # ---------------- host-side graph bookkeeping -> dense matrices ----------
    node_nums = [int(mention_id_np[i].max()) + 1 for i in range(BSZ)]  # cls + mentions
    node_off = np.concatenate([np.array([0], np.int64), np.cumsum(node_nums)])
    N_TOTAL = int(node_off[-1])

    # mention-pooling select [N_TOTAL, B*S] (cls rows all-zero), host-normalised
    sel_m = np.zeros((N_TOTAL, BS), np.float32)
    for i in range(BSZ):
        for m in range(1, node_nums[i]):
            sel_m[node_off[i] + m, i * SLEN:(i + 1) * SLEN] = \
                (mention_id_np[i] == m).astype(np.float32)
    rs = sel_m.sum(-1, keepdims=True)
    sel_m = np.where(rs > 0, sel_m / np.maximum(rs, 1.0), sel_m)

    # CLS gather / scatter one-hots (pooler runs on B rows only)
    cls_gather = np.zeros((BSZ, BS), np.float32)
    cls_scatter = np.zeros((N_TOTAL, BSZ), np.float32)
    for i in range(BSZ):
        cls_gather[i, i * SLEN] = 1.0
        cls_scatter[node_off[i], i] = 1.0

    # batched mention-graph adjacency (right-normalised), a[r, dst, src]
    def doc_adj():
        a = np.zeros((NUM_REL, 5, 5), np.float32)

        def add(r, u, v):
            a[r, v, u] = 1.0
            a[r, u, v] = 1.0
        add(0, 1, 2); add(0, 3, 4)                   # intra
        add(1, 1, 3); add(1, 2, 4)                   # inter
        for m in (1, 2, 3, 4):                       # global
            add(2, 0, m)
        return a

    A = np.zeros((NUM_REL, N_TOTAL, N_TOTAL), np.float32)
    for i in range(BSZ):
        A[:, node_off[i]:node_off[i + 1], node_off[i]:node_off[i + 1]] = doc_adj()
    deg = A.sum(axis=-1, keepdims=True)
    A_norm = A / np.maximum(deg, 1.0)

    REL_OFF = ((N_TOTAL + 7) // 8) * 8
    A_stack = np.zeros((NUM_REL * REL_OFF, N_TOTAL), np.float32)
    for r in range(NUM_REL):
        A_stack[r * REL_OFF:r * REL_OFF + N_TOTAL] = A_norm[r]

    # entity pooling select (block-diagonal, host-normalised)
    rep_rows = [t.shape[0] for t in e2m_table]
    rep_off = np.concatenate([np.array([0], np.int64), np.cumsum(rep_rows)])
    NE_TOTAL = int(rep_off[-1])
    sel_e2m = np.zeros((NE_TOTAL, N_TOTAL), np.float32)
    for i in range(BSZ):
        t = e2m_table[i].copy()
        t[0, 0] = 1.0
        sel_e2m[rep_off[i]:rep_off[i] + t.shape[0],
                node_off[i]:node_off[i] + t.shape[1]] = t
    rs = sel_e2m.sum(-1, keepdims=True)
    sel_e2m = np.where(rs > 0, sel_e2m / np.maximum(rs, 1.0), sel_e2m)

    # head / tail / global gathers as stacked one-hot rows over rep rows
    entity_num = int(entity_id_np.max())
    htp = h_t_pairs_np + (h_t_pairs_np == 0).astype(np.int64) - 1   # 0-based, pad->0
    hgt_stack = np.zeros((3 * BL, NE_TOTAL), np.float32)
    for i in range(BSZ):
        for j in range(H_T_LIMIT):
            r = i * H_T_LIMIT + j
            hgt_stack[0 * BL + r, rep_off[i] + 1 + int(htp[i, j, 0])] = 1.0
            hgt_stack[1 * BL + r, rep_off[i] + 1 + int(htp[i, j, 1])] = 1.0
            hgt_stack[2 * BL + r, rep_off[i]] = 1.0

    # RelEdgeLayer: complete digraph over per-doc entities -> src/dst one-hots
    edge_pairs = [(u, v) for u in range(entity_num) for v in range(entity_num) if u != v]
    eid_of = {p: k for k, p in enumerate(edge_pairs)}
    E_PER = len(edge_pairs)
    E_TOTAL = BSZ * E_PER
    DST_OFF = ((E_TOTAL + 7) // 8) * 8
    edgesel_stack = np.zeros((DST_OFF + E_TOTAL, NE_TOTAL), np.float32)
    for i in range(BSZ):
        for k, (u, v) in enumerate(edge_pairs):
            edgesel_stack[i * E_PER + k, rep_off[i] + 1 + u] = 1.0
            edgesel_stack[DST_OFF + i * E_PER + k, rep_off[i] + 1 + v] = 1.0

    # path aggregation (ff / fs / bf / bs); same control flow as the torch loop,
    # incl. break on relation_mask==0.  Softmax over a size-1 axis == plain sum.
    P_stack = np.zeros((4 * BL, E_TOTAL), np.float32)
    for i in range(BSZ):
        pt = path_table[i]
        for j in range(H_T_LIMIT):
            if relation_mask_np[i, j] == 0:
                break
            h = int(htp[i, j, 0])
            t = int(htp[i, j, 1])
            if (h + 1, t + 1) in pt:
                v = [val - 1 for val in pt[(h + 1, t + 1)]]
            elif (t + 1, h + 1) in pt:
                v = [val - 1 for val in pt[(t + 1, h + 1)]]
            else:
                raise AssertionError("missing path")
            base = i * E_PER
            r = i * H_T_LIMIT + j
            for m in v:
                P_stack[0 * BL + r, base + eid_of[(h, m)]] += 1.0   # forward_first
                P_stack[1 * BL + r, base + eid_of[(m, t)]] += 1.0   # forward_second
                P_stack[2 * BL + r, base + eid_of[(t, m)]] += 1.0   # backward_first
                P_stack[3 * BL + r, base + eid_of[(m, h)]] += 1.0   # backward_second

    # ---------------- weight re-layouts for the fused kernel -----------------
    emb_table = np.zeros((EMB_ROWS, GCN_DIM), np.float32)
    emb_table[:VOCAB, :BERT_HID] = tok_emb
    emb_table[VOCAB:VOCAB + ENT_TYPE_NUM, BERT_HID:BERT_HID + ENT_TYPE_SIZE] = type_emb
    emb_table[VOCAB + ENT_TYPE_NUM:, BERT_HID + ENT_TYPE_SIZE:] = id_emb

    W_enc32 = np.zeros((GCN_DIM, GCN_DIM), np.float32); W_enc32[:BERT_HID, :BERT_HID] = W_enc
    b_enc32 = np.zeros((1, GCN_DIM), np.float32); b_enc32[0, :BERT_HID] = b_enc
    W_pool32 = np.zeros((GCN_DIM, GCN_DIM), np.float32); W_pool32[:BERT_HID, :BERT_HID] = W_pool
    b_pool32 = np.zeros((1, GCN_DIM), np.float32); b_pool32[0, :BERT_HID] = b_pool
    ext_mask = np.zeros((1, GCN_DIM), np.float32); ext_mask[0, BERT_HID:] = 1.0

    gcn_blocks = []
    for l in range(GCN_LAYERS):
        Wg = np.concatenate([gcn_loop[l]] + [gcn_w[l][r] for r in range(NUM_REL)],
                            axis=0)                                   # [4D, D]
        gcn_blocks.append((f"wg{l}", Wg))
        gcn_blocks.append((f"gb{l}", gcn_b[l][None, :]))

    W_p2_pad = np.zeros((2 * BANK, OUT_PAD), np.float32); W_p2_pad[:, :RELATION_NUMS] = W_p2
    b_p2_pad = np.zeros((1, OUT_PAD), np.float32); b_p2_pad[0, :RELATION_NUMS] = b_p2

    # ---------------- pack static operands into two VMEM slabs ---------------
    W32 = max(GCN_DIM, BS)
    slab32, offs32 = _pack_rows(
        [("emb", emb_table), ("wenc", W_enc32), ("benc", b_enc32),
         ("wpool", W_pool32), ("bpool", b_pool32), ("extmask", ext_mask),
         ("selm", sel_m), ("clsg", cls_gather), ("clssc", cls_scatter),
         ("astack", A_stack)] + gcn_blocks +
        [("sele2m", sel_e2m), ("hgt", hgt_stack), ("edgesel", edgesel_stack),
         ("wedge", W_edge), ("bedge", b_edge[None, :]), ("ppath", P_stack)],
        width=W32)

    slabW, offsW = _pack_rows(
        [("wpath", W_path), ("bpath", b_path[None, :]),
         ("wp1", W_p1), ("bp1", b_p1[None, :]),
         ("wp2", W_p2_pad), ("bp2", b_p2_pad)],
        width=2 * BANK)

    dims = dict(BS=BS, EMB_ROWS=EMB_ROWS, GCN_DIM=GCN_DIM, N_TOTAL=N_TOTAL,
                NE_TOTAL=NE_TOTAL, E_TOTAL=E_TOTAL, BL=BL, GCN_LAYERS=GCN_LAYERS,
                NUM_REL=NUM_REL, REL_OFF=REL_OFF, DST_OFF=DST_OFF, OUT_PAD=OUT_PAD)

    gain_fwd = build_gain_forward(dims, offs32, offsW, slab32, slabW,
                                  act=ACT, mxu_bf16=True)

    # ---------------- fused forward (one dispatch, one Pallas kernel) --------
    @jax.jit
    def forward(words, entity_type, entity_id):
        # int ids only; all embedding gathers happen inside the kernel.
        ids = jnp.stack(
            [words.reshape(-1),
             entity_type.reshape(-1) + VOCAB,
             entity_id.reshape(-1) + VOCAB + ENT_TYPE_NUM],
            axis=-1).astype(jnp.int32)
        pred = gain_fwd(ids)                                   # [BL, 128]
        return pred[:, :RELATION_NUMS].reshape(BSZ, H_T_LIMIT, RELATION_NUMS)

    predictions = forward(words, entity_type, entity_id)
    jax.block_until_ready(predictions)
    print("KERNEL_OK")
</pallas_src>

<mosaic_0001>
module attributes {stable_mosaic.version = 11 : i64} {
  func.func @kernel(%arg0: memref<32x3xi32, #tpu.memory_space<vmem>>, %arg1: memref<664x32xf32, #tpu.memory_space<vmem>>, %arg2: memref<952x192xf32, #tpu.memory_space<vmem>>, %arg3: memref<8x128xf32, #tpu.memory_space<vmem>>) attributes {dimension_semantics = [], scalar_prefetch = 0 : i64, scratch_operands = 0 : i64, tpu.core_type = #tpu.core_type<tc>} {
    %c0 = arith.constant 0 : index
    %c0_0 = arith.constant 0 : index
    %0 = vector.load %arg0[%c0, %c0_0] : memref<32x3xi32, #tpu.memory_space<vmem>>, vector<32x3xi32>
    %1 = tpu.iota {dimensions = array<i32: 1>} : vector<32x42xi32>
    %2 = vector.extract_strided_slice %0 {offsets = [0, 0], sizes = [32, 1], strides = [1, 1]} : vector<32x3xi32> to vector<32x1xi32>
    %3 = vector.broadcast %2 : vector<32x1xi32> to vector<32x42xi32>
    %4 = arith.cmpi eq, %3, %1 : vector<32x42xi32>
    %5 = vector.extract_strided_slice %0 {offsets = [0, 1], sizes = [32, 1], strides = [1, 1]} : vector<32x3xi32> to vector<32x1xi32>
    %6 = vector.broadcast %5 : vector<32x1xi32> to vector<32x42xi32>
    %7 = arith.cmpi eq, %6, %1 : vector<32x42xi32>
    %8 = arith.ori %4, %7 : vector<32x42xi1>
    %9 = vector.extract_strided_slice %0 {offsets = [0, 2], sizes = [32, 1], strides = [1, 1]} : vector<32x3xi32> to vector<32x1xi32>
    %10 = vector.broadcast %9 : vector<32x1xi32> to vector<32x42xi32>
    %11 = arith.cmpi eq, %10, %1 : vector<32x42xi32>
    %12 = arith.ori %8, %11 : vector<32x42xi1>
    %13 = arith.extui %12 : vector<32x42xi1> to vector<32x42xi32>
    %14 = arith.sitofp %13 : vector<32x42xi32> to vector<32x42xf32>
    %c0_1 = arith.constant 0 : index
    %c0_2 = arith.constant 0 : index
    %15 = vector.load %arg1[%c0_1, %c0_2] : memref<664x32xf32, #tpu.memory_space<vmem>>, vector<42x32xf32>
    %16 = arith.truncf %14 : vector<32x42xf32> to vector<32x42xbf16>
    %17 = arith.truncf %15 : vector<42x32xf32> to vector<42x32xbf16>
    %cst = arith.constant dense<0.000000e+00> : vector<32x32xf32>
    %18 = tpu.matmul %16, %17, %cst {dimension_numbers = #tpu.dot_dimension_numbers<[1], [0], [0], [1], [0, 0, 1, 1], [], []>} : vector<32x42xbf16>, vector<42x32xbf16>, vector<32x32xf32> -> vector<32x32xf32>
    %c48 = arith.constant 48 : index
    %c0_3 = arith.constant 0 : index
    %19 = vector.load %arg1[%c48, %c0_3] : memref<664x32xf32, #tpu.memory_space<vmem>>, vector<32x32xf32>
    %20 = arith.truncf %18 : vector<32x32xf32> to vector<32x32xbf16>
    %21 = arith.truncf %19 : vector<32x32xf32> to vector<32x32xbf16>
    %cst_4 = arith.constant dense<0.000000e+00> : vector<32x32xf32>
    %22 = tpu.matmul %20, %21, %cst_4 {dimension_numbers = #tpu.dot_dimension_numbers<[1], [0], [0], [1], [0, 0, 1, 1], [], []>} : vector<32x32xbf16>, vector<32x32xbf16>, vector<32x32xf32> -> vector<32x32xf32>
    %c80 = arith.constant 80 : index
    %c0_5 = arith.constant 0 : index
    %23 = vector.load %arg1[%c80, %c0_5] : memref<664x32xf32, #tpu.memory_space<vmem>>, vector<1x32xf32>
    %24 = vector.broadcast %23 : vector<1x32xf32> to vector<32x32xf32>
    %25 = arith.addf %22, %24 : vector<32x32xf32>
    %26 = math.tanh %25 : vector<32x32xf32>
    %c128 = arith.constant 128 : index
    %c0_6 = arith.constant 0 : index
    %27 = vector.load %arg1[%c128, %c0_6] : memref<664x32xf32, #tpu.memory_space<vmem>>, vector<1x32xf32>
    %28 = vector.broadcast %27 : vector<1x32xf32> to vector<32x32xf32>
    %29 = arith.mulf %18, %28 : vector<32x32xf32>
    %30 = arith.addf %26, %29 : vector<32x32xf32>
    %c152 = arith.constant 152 : index
    %c0_7 = arith.constant 0 : index
    %31 = vector.load %arg1[%c152, %c0_7] : memref<664x32xf32, #tpu.memory_space<vmem>>, vector<2x32xf32>
    %32 = arith.truncf %31 : vector<2x32xf32> to vector<2x32xbf16>
    %33 = arith.truncf %26 : vector<32x32xf32> to vector<32x32xbf16>
    %cst_8 = arith.constant dense<0.000000e+00> : vector<2x32xf32>
    %34 = tpu.matmul %32, %33, %cst_8 {dimension_numbers = #tpu.dot_dimension_numbers<[1], [0], [0], [1], [0, 0, 1, 1], [], []>} : vector<2x32xbf16>, vector<32x32xbf16>, vector<2x32xf32> -> vector<2x32xf32>
    %c88 = arith.constant 88 : index
    %c0_9 = arith.constant 0 : index
    %35 = vector.load %arg1[%c88, %c0_9] : memref<664x32xf32, #tpu.memory_space<vmem>>, vector<32x32xf32>
    %36 = arith.truncf %34 : vector<2x32xf32> to vector<2x32xbf16>
    %37 = arith.truncf %35 : vector<32x32xf32> to vector<32x32xbf16>
    %cst_10 = arith.constant dense<0.000000e+00> : vector<2x32xf32>
    %38 = tpu.matmul %36, %37, %cst_10 {dimension_numbers = #tpu.dot_dimension_numbers<[1], [0], [0], [1], [0, 0, 1, 1], [], []>} : vector<2x32xbf16>, vector<32x32xbf16>, vector<2x32xf32> -> vector<2x32xf32>
    %c120 = arith.constant 120 : index
    %c0_11 = arith.constant 0 : index
    %39 = vector.load %arg1[%c120, %c0_11] : memref<664x32xf32, #tpu.memory_space<vmem>>, vector<1x32xf32>
    %40 = vector.broadcast %39 : vector<1x32xf32> to vector<2x32xf32>
    %41 = arith.addf %38, %40 : vector<2x32xf32>
    %42 = math.tanh %41 : vector<2x32xf32>
    %c136 = arith.constant 136 : index
    %c0_12 = arith.constant 0 : index
    %43 = vector.load %arg1[%c136, %c0_12] : memref<664x32xf32, #tpu.memory_space<vmem>>, vector<10x32xf32>
    %44 = arith.truncf %43 : vector<10x32xf32> to vector<10x32xbf16>
    %45 = arith.truncf %30 : vector<32x32xf32> to vector<32x32xbf16>
    %cst_13 = arith.constant dense<0.000000e+00> : vector<10x32xf32>
    %46 = tpu.matmul %44, %45, %cst_13 {dimension_numbers = #tpu.dot_dimension_numbers<[1], [0], [0], [1], [0, 0, 1, 1], [], []>} : vector<10x32xbf16>, vector<32x32xbf16>, vector<10x32xf32> -> vector<10x32xf32>
    %c160 = arith.constant 160 : index
    %c0_14 = arith.constant 0 : index
    %47 = vector.load %arg1[%c160, %c0_14] : memref<664x32xf32, #tpu.memory_space<vmem>>, vector<10x2xf32>
    %48 = arith.truncf %47 : vector<10x2xf32> to vector<10x2xbf16>
    %49 = arith.truncf %42 : vector<2x32xf32> to vector<2x32xbf16>
    %cst_15 = arith.constant dense<0.000000e+00> : vector<10x32xf32>
    %50 = tpu.matmul %48, %49, %cst_15 {dimension_numbers = #tpu.dot_dimension_numbers<[1], [0], [0], [1], [0, 0, 1, 1], [], []>} : vector<10x2xbf16>, vector<2x32xbf16>, vector<10x32xf32> -> vector<10x32xf32>
    %51 = arith.addf %46, %50 : vector<10x32xf32>
    %c176 = arith.constant 176 : index
    %c0_16 = arith.constant 0 : index
    %52 = vector.load %arg1[%c176, %c0_16] : memref<664x32xf32, #tpu.memory_space<vmem>>, vector<48x10xf32>
    %53 = arith.truncf %52 : vector<48x10xf32> to vector<48x10xbf16>
    %54 = arith.truncf %51 : vector<10x32xf32> to vector<10x32xbf16>
    %cst_17 = arith.constant dense<0.000000e+00> : vector<48x32xf32>
    %55 = tpu.matmul %53, %54, %cst_17 {dimension_numbers = #tpu.dot_dimension_numbers<[1], [0], [0], [1], [0, 0, 1, 1], [], []>} : vector<48x10xbf16>, vector<10x32xbf16>, vector<48x32xf32> -> vector<48x32xf32>
    %56 = vector.extract_strided_slice %55 {offsets = [0, 0], sizes = [10, 32], strides = [1, 1]} : vector<48x32xf32> to vector<10x32xf32>
    %57 = vector.extract_strided_slice %55 {offsets = [16, 0], sizes = [10, 32], strides = [1, 1]} : vector<48x32xf32> to vector<10x32xf32>
    %58 = vector.extract_strided_slice %55 {offsets = [32, 0], sizes = [10, 32], strides = [1, 1]} : vector<48x32xf32> to vector<10x32xf32>
    %59 = tpu.concatenate %51, %56, %57, %58 in 1 : vector<10x32xf32>, vector<10x32xf32>, vector<10x32xf32>, vector<10x32xf32> -> vector<10x128xf32>
    %c224 = arith.constant 224 : index
    %c0_18 = arith.constant 0 : index
    %60 = vector.load %arg1[%c224, %c0_18] : memref<664x32xf32, #tpu.memory_space<vmem>>, vector<128x32xf32>
    %61 = arith.truncf %59 : vector<10x128xf32> to vector<10x128xbf16>
    %62 = arith.truncf %60 : vector<128x32xf32> to vector<128x32xbf16>
    %cst_19 = arith.constant dense<0.000000e+00> : vector<10x32xf32>
    %63 = tpu.matmul %61, %62, %cst_19 {dimension_numbers = #tpu.dot_dimension_numbers<[1], [0], [0], [1], [0, 0, 1, 1], [], []>} : vector<10x128xbf16>, vector<128x32xbf16>, vector<10x32xf32> -> vector<10x32xf32>
    %c352 = arith.constant 352 : index
    %c0_20 = arith.constant 0 : index
    %64 = vector.load %arg1[%c352, %c0_20] : memref<664x32xf32, #tpu.memory_space<vmem>>, vector<1x32xf32>
    %65 = vector.broadcast %64 : vector<1x32xf32> to vector<10x32xf32>
    %66 = arith.addf %63, %65 : vector<10x32xf32>
    %cst_21 = arith.constant 0.000000e+00 : f32
    %67 = vector.broadcast %cst_21 : f32 to vector<10x32xf32>
    %68 = arith.maximumf %66, %67 : vector<10x32xf32>
    %c176_22 = arith.constant 176 : index
    %c0_23 = arith.constant 0 : index
    %69 = vector.load %arg1[%c176_22, %c0_23] : memref<664x32xf32, #tpu.memory_space<vmem>>, vector<48x10xf32>
    %70 = arith.truncf %69 : vector<48x10xf32> to vector<48x10xbf16>
    %71 = arith.truncf %68 : vector<10x32xf32> to vector<10x32xbf16>
    %cst_24 = arith.constant dense<0.000000e+00> : vector<48x32xf32>
    %72 = tpu.matmul %70, %71, %cst_24 {dimension_numbers = #tpu.dot_dimension_numbers<[1], [0], [0], [1], [0, 0, 1, 1], [], []>} : vector<48x10xbf16>, vector<10x32xbf16>, vector<48x32xf32> -> vector<48x32xf32>
    %73 = vector.extract_strided_slice %72 {offsets = [0, 0], sizes = [10, 32], strides = [1, 1]} : vector<48x32xf32> to vector<10x32xf32>
    %74 = vector.extract_strided_slice %72 {offsets = [16, 0], sizes = [10, 32], strides = [1, 1]} : vector<48x32xf32> to vector<10x32xf32>
    %75 = vector.extract_strided_slice %72 {offsets = [32, 0], sizes = [10, 32], strides = [1, 1]} : vector<48x32xf32> to vector<10x32xf32>
    %76 = tpu.concatenate %68, %73, %74, %75 in 1 : vector<10x32xf32>, vector<10x32xf32>, vector<10x32xf32>, vector<10x32xf32> -> vector<10x128xf32>
    %c360 = arith.constant 360 : index
    %c0_25 = arith.constant 0 : index
    %77 = vector.load %arg1[%c360, %c0_25] : memref<664x32xf32, #tpu.memory_space<vmem>>, vector<128x32xf32>
    %78 = arith.truncf %76 : vector<10x128xf32> to vector<10x128xbf16>
    %79 = arith.truncf %77 : vector<128x32xf32> to vector<128x32xbf16>
    %cst_26 = arith.constant dense<0.000000e+00> : vector<10x32xf32>
    %80 = tpu.matmul %78, %79, %cst_26 {dimension_numbers = #tpu.dot_dimension_numbers<[1], [0], [0], [1], [0, 0, 1, 1], [], []>} : vector<10x128xbf16>, vector<128x32xbf16>, vector<10x32xf32> -> vector<10x32xf32>
    %c488 = arith.constant 488 : index
    %c0_27 = arith.constant 0 : index
    %81 = vector.load %arg1[%c488, %c0_27] : memref<664x32xf32, #tpu.memory_space<vmem>>, vector<1x32xf32>
    %82 = vector.broadcast %81 : vector<1x32xf32> to vector<10x32xf32>
    %83 = arith.addf %80, %82 : vector<10x32xf32>
    %cst_28 = arith.constant 0.000000e+00 : f32
    %84 = vector.broadcast %cst_28 : f32 to vector<10x32xf32>
    %85 = arith.maximumf %83, %84 : vector<10x32xf32>
    %86 = tpu.concatenate %51, %68, %85 in 1 : vector<10x32xf32>, vector<10x32xf32>, vector<10x32xf32> -> vector<10x96xf32>
    %c496 = arith.constant 496 : index
    %c0_29 = arith.constant 0 : index
    %87 = vector.load %arg1[%c496, %c0_29] : memref<664x32xf32, #tpu.memory_space<vmem>>, vector<8x10xf32>
    %88 = arith.truncf %87 : vector<8x10xf32> to vector<8x10xbf16>
    %89 = arith.truncf %86 : vector<10x96xf32> to vector<10x96xbf16>
    %cst_30 = arith.constant dense<0.000000e+00> : vector<8x96xf32>
    %90 = tpu.matmul %88, %89, %cst_30 {dimension_numbers = #tpu.dot_dimension_numbers<[1], [0], [0], [1], [0, 0, 1, 1], [], []>} : vector<8x10xbf16>, vector<10x96xbf16>, vector<8x96xf32> -> vector<8x96xf32>
    %c504 = arith.constant 504 : index
    %c0_31 = arith.constant 0 : index
    %91 = vector.load %arg1[%c504, %c0_31] : memref<664x32xf32, #tpu.memory_space<vmem>>, vector<24x8xf32>
    %92 = arith.truncf %91 : vector<24x8xf32> to vector<24x8xbf16>
    %93 = arith.truncf %90 : vector<8x96xf32> to vector<8x96xbf16>
    %cst_32 = arith.constant dense<0.000000e+00> : vector<24x96xf32>
    %94 = tpu.matmul %92, %93, %cst_32 {dimension_numbers = #tpu.dot_dimension_numbers<[1], [0], [0], [1], [0, 0, 1, 1], [], []>} : vector<24x8xbf16>, vector<8x96xbf16>, vector<24x96xf32> -> vector<24x96xf32>
    %95 = vector.extract_strided_slice %94 {offsets = [0, 0], sizes = [8, 96], strides = [1, 1]} : vector<24x96xf32> to vector<8x96xf32>
    %96 = vector.extract_strided_slice %94 {offsets = [8, 0], sizes = [8, 96], strides = [1, 1]} : vector<24x96xf32> to vector<8x96xf32>
    %97 = vector.extract_strided_slice %94 {offsets = [16, 0], sizes = [8, 96], strides = [1, 1]} : vector<24x96xf32> to vector<8x96xf32>
    %98 = vector.extract_strided_slice %90 {offsets = [0, 64], sizes = [8, 32], strides = [1, 1]} : vector<8x96xf32> to vector<8x32xf32>
    %c528 = arith.constant 528 : index
    %c0_33 = arith.constant 0 : index
    %99 = vector.load %arg1[%c528, %c0_33] : memref<664x32xf32, #tpu.memory_space<vmem>>, vector<28x8xf32>
    %100 = arith.truncf %99 : vector<28x8xf32> to vector<28x8xbf16>
    %101 = arith.truncf %98 : vector<8x32xf32> to vector<8x32xbf16>
    %cst_34 = arith.constant dense<0.000000e+00> : vector<28x32xf32>
    %102 = tpu.matmul %100, %101, %cst_34 {dimension_numbers = #tpu.dot_dimension_numbers<[1], [0], [0], [1], [0, 0, 1, 1], [], []>} : vector<28x8xbf16>, vector<8x32xbf16>, vector<28x32xf32> -> vector<28x32xf32>
    %103 = vector.extract_strided_slice %102 {offsets = [0, 0], sizes = [12, 32], strides = [1, 1]} : vector<28x32xf32> to vector<12x32xf32>
    %104 = vector.extract_strided_slice %102 {offsets = [16, 0], sizes = [12, 32], strides = [1, 1]} : vector<28x32xf32> to vector<12x32xf32>
    %105 = tpu.concatenate %103, %104 in 1 : vector<12x32xf32>, vector<12x32xf32> -> vector<12x64xf32>
    %c560 = arith.constant 560 : index
    %c0_35 = arith.constant 0 : index
    %106 = vector.load %arg1[%c560, %c0_35] : memref<664x32xf32, #tpu.memory_space<vmem>>, vector<64x32xf32>
    %107 = arith.truncf %105 : vector<12x64xf32> to vector<12x64xbf16>
    %108 = arith.truncf %106 : vector<64x32xf32> to vector<64x32xbf16>
    %cst_36 = arith.constant dense<0.000000e+00> : vector<12x32xf32>
    %109 = tpu.matmul %107, %108, %cst_36 {dimension_numbers = #tpu.dot_dimension_numbers<[1], [0], [0], [1], [0, 0, 1, 1], [], []>} : vector<12x64xbf16>, vector<64x32xbf16>, vector<12x32xf32> -> vector<12x32xf32>
    %c624 = arith.constant 624 : index
    %c0_37 = arith.constant 0 : index
    %110 = vector.load %arg1[%c624, %c0_37] : memref<664x32xf32, #tpu.memory_space<vmem>>, vector<1x32xf32>
    %111 = vector.broadcast %110 : vector<1x32xf32> to vector<12x32xf32>
    %112 = arith.addf %109, %111 : vector<12x32xf32>
    %cst_38 = arith.constant 0.000000e+00 : f32
    %113 = vector.broadcast %cst_38 : f32 to vector<12x32xf32>
    %114 = arith.maximumf %112, %113 : vector<12x32xf32>
    %c632 = arith.constant 632 : index
    %c0_39 = arith.constant 0 : index
    %115 = vector.load %arg1[%c632, %c0_39] : memref<664x32xf32, #tpu.memory_space<vmem>>, vector<32x12xf32>
    %116 = arith.truncf %115 : vector<32x12xf32> to vector<32x12xbf16>
    %117 = arith.truncf %114 : vector<12x32xf32> to vector<12x32xbf16>
    %cst_40 = arith.constant dense<0.000000e+00> : vector<32x32xf32>
    %118 = tpu.matmul %116, %117, %cst_40 {dimension_numbers = #tpu.dot_dimension_numbers<[1], [0], [0], [1], [0, 0, 1, 1], [], []>} : vector<32x12xbf16>, vector<12x32xbf16>, vector<32x32xf32> -> vector<32x32xf32>
    %119 = vector.extract_strided_slice %118 {offsets = [0, 0], sizes = [8, 32], strides = [1, 1]} : vector<32x32xf32> to vector<8x32xf32>
    %120 = vector.extract_strided_slice %118 {offsets = [8, 0], sizes = [8, 32], strides = [1, 1]} : vector<32x32xf32> to vector<8x32xf32>
    %121 = vector.extract_strided_slice %118 {offsets = [16, 0], sizes = [8, 32], strides = [1, 1]} : vector<32x32xf32> to vector<8x32xf32>
    %122 = vector.extract_strided_slice %118 {offsets = [24, 0], sizes = [8, 32], strides = [1, 1]} : vector<32x32xf32> to vector<8x32xf32>
    %123 = tpu.concatenate %119, %120, %121, %122 in 1 : vector<8x32xf32>, vector<8x32xf32>, vector<8x32xf32>, vector<8x32xf32> -> vector<8x128xf32>
    %c0_41 = arith.constant 0 : index
    %c0_42 = arith.constant 0 : index
    %124 = vector.load %arg2[%c0_41, %c0_42] : memref<952x192xf32, #tpu.memory_space<vmem>>, vector<128x128xf32>
    %125 = arith.truncf %123 : vector<8x128xf32> to vector<8x128xbf16>
    %126 = arith.truncf %124 : vector<128x128xf32> to vector<128x128xbf16>
    %cst_43 = arith.constant dense<0.000000e+00> : vector<8x128xf32>
    %127 = tpu.matmul %125, %126, %cst_43 {dimension_numbers = #tpu.dot_dimension_numbers<[1], [0], [0], [1], [0, 0, 1, 1], [], []>} : vector<8x128xbf16>, vector<128x128xbf16>, vector<8x128xf32> -> vector<8x128xf32>
    %c128_44 = arith.constant 128 : index
    %c0_45 = arith.constant 0 : index
    %128 = vector.load %arg2[%c128_44, %c0_45] : memref<952x192xf32, #tpu.memory_space<vmem>>, vector<1x128xf32>
    %129 = vector.broadcast %128 : vector<1x128xf32> to vector<8x128xf32>
    %130 = arith.addf %127, %129 : vector<8x128xf32>
    %cst_46 = arith.constant 0.000000e+00 : f32
    %131 = vector.broadcast %cst_46 : f32 to vector<8x128xf32>
    %132 = arith.maximumf %130, %131 : vector<8x128xf32>
    %133 = arith.subf %95, %96 : vector<8x96xf32>
    %134 = math.absf %133 : vector<8x96xf32>
    %135 = arith.mulf %95, %96 : vector<8x96xf32>
    %136 = tpu.concatenate %95, %96, %134, %135, %97, %132 in 1 : vector<8x96xf32>, vector<8x96xf32>, vector<8x96xf32>, vector<8x96xf32>, vector<8x96xf32>, vector<8x128xf32> -> vector<8x608xf32>
    %c136_47 = arith.constant 136 : index
    %c0_48 = arith.constant 0 : index
    %137 = vector.load %arg2[%c136_47, %c0_48] : memref<952x192xf32, #tpu.memory_space<vmem>>, vector<608x192xf32>
    %138 = arith.truncf %136 : vector<8x608xf32> to vector<8x608xbf16>
    %139 = arith.truncf %137 : vector<608x192xf32> to vector<608x192xbf16>
    %cst_49 = arith.constant dense<0.000000e+00> : vector<8x192xf32>
    %140 = tpu.matmul %138, %139, %cst_49 {dimension_numbers = #tpu.dot_dimension_numbers<[1], [0], [0], [1], [0, 0, 1, 1], [], []>} : vector<8x608xbf16>, vector<608x192xbf16>, vector<8x192xf32> -> vector<8x192xf32>
    %c744 = arith.constant 744 : index
    %c0_50 = arith.constant 0 : index
    %141 = vector.load %arg2[%c744, %c0_50] : memref<952x192xf32, #tpu.memory_space<vmem>>, vector<1x192xf32>
    %142 = vector.broadcast %141 : vector<1x192xf32> to vector<8x192xf32>
    %143 = arith.addf %140, %142 : vector<8x192xf32>
    %cst_51 = arith.constant 0.000000e+00 : f32
    %144 = vector.broadcast %cst_51 : f32 to vector<8x192xf32>
    %145 = arith.maximumf %143, %144 : vector<8x192xf32>
    %c752 = arith.constant 752 : index
    %c0_52 = arith.constant 0 : index
    %146 = vector.load %arg2[%c752, %c0_52] : memref<952x192xf32, #tpu.memory_space<vmem>>, vector<192x128xf32>
    %147 = arith.truncf %145 : vector<8x192xf32> to vector<8x192xbf16>
    %148 = arith.truncf %146 : vector<192x128xf32> to vector<192x128xbf16>
    %cst_53 = arith.constant dense<0.000000e+00> : vector<8x128xf32>
    %149 = tpu.matmul %147, %148, %cst_53 {dimension_numbers = #tpu.dot_dimension_numbers<[1], [0], [0], [1], [0, 0, 1, 1], [], []>} : vector<8x192xbf16>, vector<192x128xbf16>, vector<8x128xf32> -> vector<8x128xf32>
    %c944 = arith.constant 944 : index
    %c0_54 = arith.constant 0 : index
    %150 = vector.load %arg2[%c944, %c0_54] : memref<952x192xf32, #tpu.memory_space<vmem>>, vector<1x128xf32>
    %151 = vector.broadcast %150 : vector<1x128xf32> to vector<8x128xf32>
    %152 = arith.addf %149, %151 : vector<8x128xf32>
    %c0_55 = arith.constant 0 : index
    %c0_56 = arith.constant 0 : index
    %153 = vector.load %arg3[%c0_55, %c0_56] : memref<8x128xf32, #tpu.memory_space<vmem>>, vector<8x128xf32>
    tpu.vector_store %arg3[%c0_55, %c0_56], %152 {strides = array<i32>} : memref<8x128xf32, #tpu.memory_space<vmem>>, vector<8x128xf32>,
    return
  }
}

</mosaic_0001>

<bundles_post_ra>
// kernel: forward.1
= control target key start
LH: loop header
LB: loop body
LE: loop exit
PB: predicated region body
PF: predicated region fallthrough
CT: control target
= control target key end

     0   :  { %8 = vsyncpa [#allocation3], 0  ;;  %s2484_s0 = inlined_call_operand.vmem [shape: s32[32,3], index: 0, kind: input, shape index: {}]   ;;  %s2485_s1 = inlined_call_operand.hbm [shape: f32[664,32], index: 1, kind: input, shape index: {}]   ;;  %s2486_s2 = inlined_call_operand.hbm [shape: f32[952,192], index: 2, kind: input, shape index: {}]   ;;  %s2487_s3 = inlined_call_operand.hbm [shape: f32[8,128], index: 3, kind: output, shape index: {}]  }
   0x1   :  { %9 = vsyncpa [#allocation6], 0 }
   0x2   :  { %10 = vsyncpa [#allocation4], 0  ;;  %s2187_s12 = smov [#allocation2]   ;;  %s2115_s16 = scalar_lea.hbm %s2485_s1, 10624 }
   0x3   :  { %s18_s13 = sshll.u32 %s2187_s12, 4  ;;  %p2116_p0 = scmp.ne.s32.totalorder %s2485_s1, %s2115_s16  ;;  %s19_s13 = int_to_ptr.vmem [resolvable:$true] %s18_s13 }
   0x4   :  { %p2119_p1 = scmp.lt.u32.totalorder %s2115_s16, %s2485_s1 }
   0x6   :  { %p2121_p2 = pnand %p2119_p1, %p2116_p0 }
   0x8   :  { %2124 = shalt.err (!%p2121_p2)
}
   0x9   :  { %s2125_s21 = scalar_lea.vmem %s19_s13, 10624  ;;  %p2130_p4 = scmp.lt.s32.totalorder %s19_s13, %s19_s13 }
   0xa   :  { %p2126_p3 = scmp.ne.s32.totalorder %s19_s13, %s2125_s21  ;;  %p2131_p5 = scmp.lt.s32.totalorder %s2125_s21, %s2125_s21 }
   0xc   :  { %p2132_p6 = por %p2131_p5, %p2130_p4 }
   0xe   :  { %p2133_p7 = pnand %p2132_p6, %p2126_p3 }
  0x10   :  { %2136 = shalt.err (!%p2133_p7)
}
  0x11   :  { %s2188_s22 = smov 128   ;;  %s2189_s23 = smov 8  }
  0x12   :  { %24 = dma.hbm_to_vmem [thread:$0]  %s2485_s1, 10624, %s19_s13, [#allocation3], %s2188_s22, %s2188_s22, %s2189_s23  }
  0x13   :  { %s2190_s26 = smov [#allocation5]   ;;  %s2137_s30 = scalar_lea.hbm %s2486_s2, 30464 }
  0x14   :  { %s30_s27 = sshll.u32 %s2190_s26, 4  ;;  %p2138_p8 = scmp.ne.s32.totalorder %s2486_s2, %s2137_s30  ;;  %s31_s27 = int_to_ptr.vmem [resolvable:$true] %s30_s27 }
  0x15   :  { %p2141_p9 = scmp.lt.u32.totalorder %s2137_s30, %s2486_s2 }
  0x17   :  { %p2143_p10 = pnand %p2141_p9, %p2138_p8 }
  0x19   :  { %2146 = shalt.err (!%p2143_p10)
}
  0x1a   :  { %s2147_s8 = scalar_lea.vmem %s31_s27, 30464  ;;  %p2152_p12 = scmp.lt.s32.totalorder %s31_s27, %s31_s27 }
  0x1b   :  { %p2148_p11 = scmp.ne.s32.totalorder %s31_s27, %s2147_s8  ;;  %p2153_p13 = scmp.lt.s32.totalorder %s2147_s8, %s2147_s8 }
  0x1d   :  { %p2154_p0 = por %p2153_p13, %p2152_p12 }
  0x1f   :  { %p2155_p1 = pnand %p2154_p0, %p2148_p11 }
  0x21   :  { %2158 = shalt.err (!%p2155_p1)
}
  0x22   :  { %s2191_s1 = smov 256   ;;  %s2192_s9 = smov 16  }
  0x23   :  { %36 = dma.hbm_to_vmem [thread:$0]  %s2486_s2, 30464, %s31_s27, [#allocation6], %s2191_s1, %s2191_s1, %s2192_s9  }
  0x24   :  { %2181 = dma.done.wait [#allocation3], 10624  }
  0x25   :  { %2182 = vsyncadd [#allocation3], 4294956672 }
  0x26   :  { %2183 = dma.done.wait [#allocation6], 30464  }
  0x27   :  { %2184 = vsyncadd [#allocation6], 4294936832  ;;  %v2193_v0 = vmov 1   ;;  %v2194_v1 = vmov 0   ;;  %v44_v2 = vld [vmem:[%s2484_s0] sm:$0xff]  ;;  %v45_v3 = vld [vmem:[%s2484_s0 + $0x8] sm:$0xff]  ;;  %v48_v25 = vlaneseq }
  0x28   :  { %2054 = vset.pattern.permute.xlu1 %v2193_v0  ;;  %2053 = vset.pattern.permute.xlu0 %v2194_v1  ;;  %v46_v4 = vld [vmem:[%s2484_s0 + $0x10] sm:$0xff]  ;;  %v47_v5 = vld [vmem:[%s2484_s0 + $0x18] sm:$0xff]  ;;  %v2195_v6 = vmov 2   ;;  %v106_v7 = vld [vmem:[#allocation2] sm:$0xff]  ;;  %v2196_v10 = vmov 0.0   ;;  %vm132_vm0 = vcmask 1044480  }
  0x29   :  { %67 = vperm.xlu1 %2054, %v44_v2   ;;  %51 = vperm.xlu0 %2053, %v44_v2   ;;  %v107_v8 = vld [vmem:[#allocation2 + $0x8] sm:$0xff]  ;;  %v108_v11 = vld [vmem:[#allocation2 + $0x10] sm:$0xff]  ;;  %v109_v12 = vld [vmem:[#allocation2 + $0x18] sm:$0xff]  ;;  %v49_v28 = vand.u32 127, %v48_v25  ;;  %vm125_vm11 = vcmask 343040   ;;  %s2198_s0 = smov 32  }
  0x2a   :  { %v122_v9 = vpack.c.bf16 %v107_v8, %v106_v7  ;;  %1876 = vmatprep.subr.bf16.mxu0 %v2196_v10  ;;  %v123_v13 = vpack.c.bf16 %v109_v12, %v108_v11  ;;  %v110_v14 = vld [vmem:[#allocation2 + $0x20] sm:$0xff]  ;;  %v111_v15 = vld [vmem:[#allocation2 + $0x28] sm:$0x3]  ;;  %v185_v18 = vld [vmem:[#allocation2 + $0x30] sm:$0xff]  ;;  %s2199_s19 = smov 64   ;;  %s2200_s20 = smov 96  }
  0x2b   :  { %v124_v16 = vpack.c.bf16 %v111_v15, %v110_v14  ;;  %v186_v19 = vld [vmem:[#allocation2 + $0x38] sm:$0xff]  ;;  %v187_v41 = vld [vmem:[#allocation2 + $0x40] sm:$0xff]  ;;  %v188_v42 = vld [vmem:[#allocation2 + $0x48] sm:$0xff]  ;;  %s2201_s21 = smov [#allocation7]  }
  0x2c   :  { %1850 = vmatprep.subr.bf16.mxu1 %v122_v9  ;;  %v191_v20 = vpack.c.bf16 %v186_v19, %v185_v18  ;;  %v192_v43 = vpack.c.bf16 %v188_v42, %v187_v41  ;;  %v318_v50 = vld [vmem:[#allocation2 + $0x58] sm:$0xff]  ;;  %v319_v51 = vld [vmem:[#allocation2 + $0x60] sm:$0xff]  ;;  %v1751_v53 = vld [vmem:[#allocation2 + $0x50] ss:$0 sm:$0xff]  ;;  %s1735_s22 = sshll.u32 %s2201_s21, 4  ;;  %s1736_s22 = int_to_ptr.vmem [resolvable:$true] %s1735_s22 }
  0x2d   :  { %70 = vperm.xlu1 %2054, %v45_v3   ;;  %54 = vperm.xlu0 %2053, %v45_v3   ;;  %v134_v17 = vsel %vm132_vm0, %v124_v16, 0  ;;  %v323_v52 = vpack.c.bf16 %v319_v51, %v318_v50  ;;  %v1754_v62 = vld [vmem:[#allocation2 + $0x80] ss:$0 sm:$0xff]  ;;  %v320_v19 = vld [vmem:[#allocation2 + $0x68] sm:$0xff]  ;;  %v375_v41 = vld [vmem:[#allocation2 + $0x90] sm:$0x3]  ;;  %p2164_p3 = scmp.lt.s32.totalorder %s1736_s22, %s1736_s22 }
  0x2e   :  { %1851 = vmatpush3.bf16.msra.mxu1 %v122_v9  ;;  %s2159_s23 = scalar_lea.vmem %s1736_s22, 128 }
  0x2f   :  { %1852 = vmatprep.subr.bf16.mxu1 %v123_v13  ;;  %1877 = vmatpush3.bf16.msra.mxu0 %v323_v52  ;;  %v478_v52 = vld [vmem:[#allocation2 + $0xc0] sm:$0xff]  ;;  %p2160_p2 = scmp.ne.s32.totalorder %s1736_s22, %s2159_s23  ;;  %p2165_p4 = scmp.lt.s32.totalorder %s2159_s23, %s2159_s23 }
  0x30   :  { %1878 = vmatprep.subr.bf16.mxu0 %v2196_v10 }
  0x31   :  { %2055 = vset.pattern.permute.xlu1 %v2194_v1  ;;  %57 = vperm.xlu0 %2053, %v46_v4   ;;  %p2166_p5 = por %p2165_p4, %p2164_p3 }
  0x32   :  { %60 = vperm.xlu1 %2055, %v47_v5   ;;  %1853 = vmatpush3.bf16.msra.mxu1 %v123_v13 }
  0x33   :  { %2034 = vmatprep.subr.msk.bf16.mxu1 %vm132_vm0, %v124_v16  ;;  %v271_v16 = vld [vmem:[#allocation2 + $0x98] sm:$0x3]  ;;  %p2167_p6 = pnand %p2166_p5, %p2160_p2 }
  0x34   :  { %v272_v18 = vpack.c.bf16 %v271_v16, %v271_v16 }
  0x35   :  { %2056 = vset.pattern.permute.xlu0 %v2193_v0 }
  0x36   :  { %2057 = vset.pattern.permute.xlu1 %v2193_v0  ;;  %73 = vperm.xlu0 %2056, %v46_v4  }
  0x37   :  { %76 = vperm.xlu1 %2057, %v47_v5   ;;  %1855 = vmatpush3.bf16.msra.mxu1 %v134_v17 }
  0x38   :  { %1860 = vmatprep.subr.bf16.mxu1 %v191_v20 }
  0x3a   :  { %2059 = vset.pattern.permute.xlu0 %v2195_v6 }
  0x3b   :  { %2058 = vset.pattern.permute.xlu1 %v2195_v6  ;;  %90 = vperm.xlu0 %2059, %v45_v3  }
  0x3c   :  { %87 = vperm.xlu1 %2058, %v44_v2  }
  0x40   :  { %93 = vperm.xlu1 %2058, %v46_v4  }
  0x44   :  { %96 = vperm.xlu1 %2058, %v47_v5  }
  0xa8   :  { %v68_v21 = vpop.permute.xlu1 %67  ;;  %v52_v22 = vpop.permute.xlu0 %51 }
  0xa9   :  { %vm78_vm1 = vcmp.eq.s32.totalorder %v68_v21, %v49_v28  ;;  %vm62_vm2 = vcmp.eq.s32.totalorder %v52_v22, %v49_v28 }
  0xaa   :  { %vm82_vm5 = vmor %vm62_vm2, %vm78_vm1 }
  0xac   :  { %v71_v23 = vpop.permute.xlu1 %70  ;;  %v55_v24 = vpop.permute.xlu0 %54 }
  0xad   :  { %vm79_vm3 = vcmp.eq.s32.totalorder %v71_v23, %v49_v28  ;;  %vm63_vm4 = vcmp.eq.s32.totalorder %v55_v24, %v49_v28 }
  0xae   :  { %vm83_vm6 = vmor %vm63_vm4, %vm79_vm3 }
  0xb0   :  { %v58_v26 = vpop.permute.xlu0 %57 }
  0xb1   :  { %v61_v27 = vpop.permute.xlu1 %60  ;;  %vm64_vm14 = vcmp.eq.s32.totalorder %v58_v26, %v49_v28 }
  0xb2   :  { %vm65_vm2 = vcmp.eq.s32.totalorder %v61_v27, %v49_v28 }
  0xb5   :  { %v74_v29 = vpop.permute.xlu0 %73 }
  0xb6   :  { %v77_v30 = vpop.permute.xlu1 %76  ;;  %vm80_vm12 = vcmp.eq.s32.totalorder %v74_v29, %v49_v28 }
  0xb7   :  { %vm81_vm15 = vcmp.eq.s32.totalorder %v77_v30, %v49_v28  ;;  %vm84_vm1 = vmor %vm64_vm14, %vm80_vm12  ;;  %vm582_vm12 = vcmask 523264   ;;  %vm900_vm14 = vcmask 64512  }
  0xb8   :  { %vm85_vm4 = vmor %vm65_vm2, %vm81_vm15  ;;  %vm907_vm15 = vcmask 1043456  }
  0xba   :  { %v91_v31 = vpop.permute.xlu0 %90 }
  0xbb   :  { %vm99_vm7 = vcmp.eq.s32.totalorder %v91_v31, %v49_v28  ;;  %v88_v32 = vpop.permute.xlu1 %87 }
  0xbc   :  { %vm103_vm8 = vmor %vm83_vm6, %vm99_vm7  ;;  %vm98_vm9 = vcmp.eq.s32.totalorder %v88_v32, %v49_v28  ;;  %vm198_vm7 = vcmask 261120  }
  0xbd   :  { %vm102_vm10 = vmor %vm82_vm5, %vm98_vm9  ;;  %v1746_v33 = vsel %vm103_vm8, 1.0, %v2196_v10  ;;  %vm2197_vm8 = vmmov 0   ;;  %vm387_vm9 = vcmask 1040384  }
  0xbe   :  { %v1745_v34 = vsel %vm102_vm10, 1.0, %v2196_v10  ;;  %1880 = vmatprep.mubr.msk.bf16.mxu0 %vm2197_vm8, %v2196_v10  ;;  %vm383_vm10 = vcmask 15360  }
  0xbf   :  { %v94_v35 = vpop.permute.xlu1 %93  ;;  %v120_v36 = vpack.c.bf16 %v1746_v33, %v1745_v34 }
  0xc0   :  { %vm100_vm13 = vcmp.eq.s32.totalorder %v94_v35, %v49_v28  ;;  %v379_v35 = vld [vmem:[#allocation2 + $0xa0] sm:$0xff] }
  0xc1   :  { %1856 = vmatprep.mubr.msk.bf16.mxu1 %vm125_vm11, %v120_v36  ;;  %vm104_vm3 = vmor %vm84_vm1, %vm100_vm13  ;;  %v380_v36 = vld [vmem:[#allocation2 + $0xa8] sm:$0x3]  ;;  %vm585_vm13 = vcmask 785408   ;;  %vm1114_vm1 = vcmask 1045504  }
  0xc2   :  { %v1747_v38 = vsel %vm104_vm3, 1.0, %v2196_v10 }
  0xc3   :  { %v97_v37 = vpop.permute.xlu1 %96 }
  0xc4   :  { %vm101_vm6 = vcmp.eq.s32.totalorder %v97_v37, %v49_v28  ;;  %v1756_v28 = vld [vmem:[#allocation2 + $0x78] ss:$0 sm:$0xff] }
  0xc5   :  { %vm105_vm5 = vmor %vm85_vm4, %vm101_vm6 }
  0xc6   :  { %v1748_v39 = vsel %vm105_vm5, 1.0, %v2196_v10 }
  0xc7   :  { %v121_v40 = vpack.c.bf16 %v1748_v39, %v1747_v38  ;;  %v381_v39 = vpack.c.bf16 %v380_v36, %v379_v35 }
  0xc9   :  { %1857 = vmatmul.mubr.msk.bf16.vlgmr.msra.gmra.mrb[0].mxu1 %vm125_vm11, %v121_v40  ;;  %v374_v40 = vld [vmem:[#allocation2 + $0x88] sm:$0xff]  ;;  %vm486_vm11 = vcmask 80896  }
  0xca   :  { %1861 = vmatpush3.bf16.msra.mxu1 %v191_v20  ;;  %v321_v20 = vld [vmem:[#allocation2 + $0x70] sm:$0xff]  ;;  %v376_v42 = vpack.c.bf16 %v375_v41, %v374_v40 }
  0xcb   :  { %1862 = vmatprep.subr.bf16.mxu1 %v192_v43  ;;  %v324_v21 = vpack.c.bf16 %v321_v20, %v320_v19 }
  0xcd   :  { %1879 = vmatpush3.bf16.msra.mxu0 %v324_v21 }
  0xce   :  { %1863 = vmatpush3.bf16.msra.mxu1 %v192_v43  ;;  %1898 = vmatprep.subr.bf16.mxu0 %v2196_v10 }
  0xcf   :  { %1868 = vmatprep.subr.bf16.mxu1 %v2196_v10 }
 0x19c   :  { %v1858_v44 = vpop.f32.mrb[0].mxu1 }
 0x19d   :  { %v170_v45 = vpop.f32.mrb[1].mxu1  ;;  %v265_v63 = vmul.f32 %v1858_v44, %v1754_v62 }
 0x19e   :  { %v1859_v46 = vpop.f32.mrb[2].mxu1  ;;  %v263_v2 = vmul.f32 %v1754_v62, %v170_v45 }
 0x19f   :  { %v190_v47 = vpack.c.bf16 %v1859_v46, %v1858_v44  ;;  %v173_v48 = vpop.f32.mrb[3].mxu1  ;;  %v266_v4 = vmul.f32 %v1859_v46, %v1754_v62  ;;  %v476_v46 = vld [vmem:[#allocation2 + $0xb0] sm:$0xff] }
 0x1a0   :  { %v189_v49 = vpack.c.bf16 %v173_v48, %v170_v45  ;;  %v264_v7 = vmul.f32 %v1754_v62, %v173_v48  ;;  %v591_v62 = vld [vmem:[#allocation2 + $0xf8] sm:$0xff] }
 0x1a2   :  { %1864 = vmatprep.mubr.msk.bf16.mxu1 %vm198_vm7, %v189_v49 }
 0x1a3   :  { %1865 = vmatmul.mubr.msk.bf16.vlgmr.msra.gmra.mrb[4].mxu1 %vm198_vm7, %v190_v47  ;;  %v477_v47 = vld [vmem:[#allocation2 + $0xb8] sm:$0xff] }
 0x1a4   :  { %1872 = vmatprep.mubr.msk.bf16.mxu1 %vm2197_vm8, %v2196_v10  ;;  %v2302_v51 = vpack.c.bf16 %v477_v47, %v476_v46 }
 0x276   :  { %v1866_v54 = vpop.f32.mrb[4].mxu1 }
 0x277   :  { %v248_v55 = vadd.f32 %v1866_v54, %v1751_v53  ;;  %v239_v56 = vpop.f32.mrb[5].mxu1 }
 0x278   :  { %v240_v57 = vadd.f32 %v1751_v53, %v239_v56  ;;  %v1867_v58 = vpop.f32.mrb[6].mxu1  ;;  %v481_v56 = vld [vmem:[#allocation2 + $0xd8] sm:$0xff] }
 0x279   :  { %2105 = vtanh.f32 %v248_v55  ;;  %v251_v59 = vadd.f32 %v1867_v58, %v1751_v53  ;;  %v242_v60 = vpop.f32.mrb[7].mxu1  ;;  %v480_v55 = vld [vmem:[#allocation2 + $0xd0] sm:$0xff]  ;;  %v588_v58 = vld [vmem:[#allocation2 + $0xe0] sm:$0xff] }
 0x27a   :  { %2107 = vtanh.f32 %v240_v57  ;;  %v243_v61 = vadd.f32 %v1751_v53, %v242_v60  ;;  %v479_v53 = vld [vmem:[#allocation2 + $0xc8] sm:$0xff]  ;;  %v2315_v57 = vpack.c.bf16 %v481_v56, %v480_v55  ;;  %v590_v60 = vld [vmem:[#allocation2 + $0xf0] sm:$0xff]  ;;  %v1763_v56 = vld [vmem:[#allocation2 + $0x160] ss:$0 sm:$0xff] }
 0x27b   :  { %2109 = vtanh.f32 %v251_v59  ;;  %v2309_v54 = vpack.c.bf16 %v479_v53, %v478_v52  ;;  %v589_v59 = vld [vmem:[#allocation2 + $0xe8] sm:$0xff] }
 0x27c   :  { %2111 = vtanh.f32 %v243_v61  ;;  %v605_v61 = vpack.c.bf16 %v589_v59, %v588_v58 }
 0x283   :  { %v2106_v0 = vpop.eup %2105 }
 0x284   :  { %v2108_v3 = vpop.eup %2107  ;;  %v269_v5 = vadd.f32 %v2106_v0, %v265_v63  ;;  %v606_v63 = vpack.c.bf16 %v591_v62, %v590_v60 }
 0x285   :  { %v2110_v6 = vpop.eup %2109  ;;  %v267_v8 = vadd.f32 %v2108_v3, %v263_v2  ;;  %v593_v2 = vld [vmem:[#allocation2 + $0x108] sm:$0xff] }
 0x286   :  { %v2112_v9 = vpop.eup %2111  ;;  %v274_v11 = vpack.c.bf16 %v2110_v6, %v2106_v0  ;;  %v270_v12 = vadd.f32 %v2110_v6, %v266_v4  ;;  %v592_v0 = vld [vmem:[#allocation2 + $0x100] sm:$0xff]  ;;  %v594_v4 = vld [vmem:[#allocation2 + $0x110] sm:$0xff] }
 0x287   :  { %v273_v13 = vpack.c.bf16 %v2112_v9, %v2108_v3  ;;  %v268_v14 = vadd.f32 %v2112_v9, %v264_v7  ;;  %v607_v3 = vpack.c.bf16 %v593_v2, %v592_v0  ;;  %v596_v7 = vld [vmem:[#allocation2 + $0x120] sm:$0xff] }
 0x288   :  { %v378_v15 = vpack.c.bf16 %v270_v12, %v269_v5  ;;  %v595_v5 = vld [vmem:[#allocation2 + $0x118] sm:$0xff] }
 0x289   :  { %1869 = vmatpush3.bf16.msra.mxu1 %v273_v13  ;;  %v377_v17 = vpack.c.bf16 %v268_v14, %v267_v8  ;;  %v608_v6 = vpack.c.bf16 %v595_v5, %v594_v4  ;;  %v597_v8 = vld [vmem:[#allocation2 + $0x128] sm:$0xff]  ;;  %v599_v12 = vld [vmem:[#allocation2 + $0x138] sm:$0xff] }
 0x28a   :  { %1870 = vmatprep.subr.bf16.mxu1 %v2196_v10  ;;  %v609_v9 = vpack.c.bf16 %v597_v8, %v596_v7  ;;  %v752_v5 = vld [vmem:[#allocation2 + $0x168] sm:$0xff]  ;;  %v754_v7 = vld [vmem:[#allocation2 + $0x178] sm:$0xff] }
 0x28d   :  { %1871 = vmatpush3.bf16.msra.mxu1 %v274_v11  ;;  %v598_v11 = vld [vmem:[#allocation2 + $0x130] sm:$0xff] }
 0x28e   :  { %1884 = vmatprep.subr.bf16.mxu1 %v2196_v10  ;;  %v610_v14 = vpack.c.bf16 %v599_v12, %v598_v11  ;;  %v756_v11 = vld [vmem:[#allocation2 + $0x188] sm:$0xff] }
 0x290   :  { %1873 = vmatmul.mubr.msk.bf16.vlgmr.msra.gmra.mrb[8].mxu1 %vm198_vm7, %v272_v18  ;;  %v601_v18 = vld [vmem:[#allocation2 + $0x148] sm:$0xff] }
 0x291   :  { %1886 = vmatprep.mubr.msk.bf16.mxu1 %vm2197_vm8, %v2196_v10 }
 0x363   :  { %v312_v22 = vpop.f32.mrb[8].mxu1 }
 0x364   :  { %v322_v23 = vpack.c.bf16 %v312_v22, %v312_v22  ;;  %v1874_v24 = vpop.f32.mrb[9].mxu1  ;;  %v602_v22 = vld [vmem:[#allocation2 + $0x150] sm:$0xff] }
 0x365   :  { %v315_v26 = vpop.f32.mrb[10].mxu1 }
 0x366   :  { %v1875_v27 = vpop.f32.mrb[11].mxu1  ;;  %1881 = vmatmul.mubr.msk.bf16.vlgmr.msra.gmra.mrb[0].mxu0 %vm198_vm7, %v322_v23  ;;  %v603_v23 = vld [vmem:[#allocation2 + $0x158] sm:$0xff] }
 0x367   :  { %1900 = vmatprep.mubr.msk.bf16.mxu0 %vm2197_vm8, %v2196_v10  ;;  %v612_v26 = vpack.c.bf16 %v603_v23, %v602_v22 }
 0x439   :  { %v367_v29 = vpop.f32.mrb[0].mxu0 }
 0x43a   :  { %v368_v30 = vadd.f32 %v1756_v28, %v367_v29  ;;  %v1882_v31 = vpop.f32.mrb[1].mxu0 }
 0x43b   :  { %v370_v32 = vpop.f32.mrb[2].mxu0 }
 0x43c   :  { %2113 = vtanh.f32 %v368_v30  ;;  %v1883_v33 = vpop.f32.mrb[3].mxu0 }
 0x446   :  { %v2114_v34 = vpop.eup %2113 }
 0x447   :  { %v382_v37 = vpack.c.bf16 %v2114_v34, %v2114_v34 }
 0x449   :  { %v389_v38 = vsel %vm387_vm9, %v382_v37, 0 }
 0x44a   :  { %1885 = vmatpush3.bf16.msra.mxu1 %v389_v38 }
 0x44b   :  { %1890 = vmatprep.subr.bf16.mxu1 %v2196_v10 }
 0x44d   :  { %1887 = vmatmul.mubr.msk.bf16.vlgmr.msra.gmra.mrb[12].mxu1 %vm383_vm10, %v381_v39 }
 0x44e   :  { %1891 = vmatpush3.bf16.msra.mxu1 %v377_v17  ;;  %1894 = vmatprep.mubr.msk.bf16.mxu1 %vm2197_vm8, %v2196_v10  ;;  %v600_v17 = vld [vmem:[#allocation2 + $0x140] sm:$0xff] }
 0x44f   :  { %1892 = vmatprep.subr.bf16.mxu1 %v2196_v10  ;;  %v611_v21 = vpack.c.bf16 %v601_v18, %v600_v17  ;;  %v762_v18 = vld [vmem:[#allocation2 + $0x1b8] sm:$0xff] }
 0x452   :  { %1893 = vmatpush3.bf16.msra.mxu1 %v378_v15 }
 0x453   :  { %1932 = vmatprep.subr.bf16.mxu1 %v2196_v10 }
 0x459   :  { %1895 = vmatmul.mubr.msk.bf16.vlgmr.msra.gmra.mrb[12].mxu1 %vm198_vm7, %v376_v42 }
 0x45a   :  { %1934 = vmatprep.mubr.msk.bf16.mxu1 %vm2197_vm8, %v2196_v10 }
 0x52c   :  { %v2295_v43 = vpop.f32.mrb[12].mxu1 }
 0x52d   :  { %v1896_v44 = vpop.f32.mrb[13].mxu1 }
 0x52e   :  { %v2297_v45 = vpop.f32.mrb[14].mxu1 }
 0x52f   :  { %v485_v48 = vpack.c.bf16 %v2297_v45, %v2295_v43  ;;  %v1897_v49 = vpop.f32.mrb[15].mxu1 }
 0x531   :  { %v497_v50 = vsel %vm132_vm0, %v485_v48, 0 }
 0x532   :  { %1899 = vmatpush3.bf16.msra.mxu0 %v497_v50 }
 0x533   :  { %1912 = vmatprep.subr.bf16.mxu0 %v2196_v10 }
 0x535   :  { %1901 = vmatmul.mubr.msk.bf16.vlgmr.msra.gmra.mrb[4].mxu0 %vm486_vm11, %v2302_v51 }
 0x536   :  { %1904 = vmatprep.mubr.msk.bf16.mxu0 %vm2197_vm8, %v2196_v10  ;;  %1913 = vmatpush3.bf16.msra.mxu0 %v605_v61 }
 0x537   :  { %1914 = vmatprep.subr.bf16.mxu0 %v2196_v10 }
 0x53a   :  { %1915 = vmatpush3.bf16.msra.mxu0 %v606_v63 }
 0x53b   :  { %1916 = vmatprep.subr.bf16.mxu0 %v2196_v10 }
 0x53d   :  { %1905 = vmatmul.mubr.msk.bf16.gmra.mrb[8].mxu0 %vm486_vm11, %v2309_v54 }
 0x53e   :  { %1908 = vmatprep.mubr.msk.bf16.mxu0 %vm2197_vm8, %v2196_v10  ;;  %1917 = vmatpush3.bf16.msra.mxu0 %v607_v3 }
 0x53f   :  { %1918 = vmatprep.subr.bf16.mxu0 %v2196_v10 }
 0x542   :  { %1919 = vmatpush3.bf16.msra.mxu0 %v608_v6  ;;  %v753_v6 = vld [vmem:[#allocation2 + $0x170] sm:$0xff] }
 0x543   :  { %1920 = vmatprep.subr.bf16.mxu0 %v2196_v10  ;;  %v769_v8 = vpack.c.bf16 %v753_v6, %v752_v5 }
 0x545   :  { %1909 = vmatmul.mubr.msk.bf16.gmra.mrb[12].mxu0 %vm486_vm11, %v2315_v57 }
 0x546   :  { %1928 = vmatprep.mubr.msk.bf16.mxu0 %vm2197_vm8, %v2196_v10  ;;  %1921 = vmatpush3.bf16.msra.mxu0 %v609_v9 }
 0x547   :  { %1922 = vmatprep.subr.bf16.mxu0 %v2196_v10 }
 0x54a   :  { %1923 = vmatpush3.bf16.msra.mxu0 %v610_v14 }
 0x54b   :  { %1924 = vmatprep.subr.bf16.mxu0 %v2196_v10 }
 0x54e   :  { %1925 = vmatpush3.bf16.msra.mxu0 %v611_v21 }
 0x54f   :  { %1926 = vmatprep.subr.bf16.mxu0 %v2196_v10 }
 0x552   :  { %1927 = vmatpush3.bf16.msra.mxu0 %v612_v26 }
 0x553   :  { %1966 = vmatprep.subr.bf16.mxu0 %v2196_v10 }
 0x608   :  { %v533_v13 = vpop.f32.mrb[4].mxu0 }
 0x609   :  { %v1902_v15 = vpop.f32.mrb[5].mxu0 }
 0x60a   :  { %v536_v16 = vpop.f32.mrb[6].mxu0  ;;  %v760_v15 = vld [vmem:[#allocation2 + $0x1a8] sm:$0xff] }
 0x60b   :  { %v2060_v19 = vpack.i.bf16 %v536_v16, %v533_v13  ;;  %v1903_v20 = vpop.f32.mrb[7].mxu0  ;;  %v759_v13 = vld [vmem:[#allocation2 + $0x1a0] sm:$0xff]  ;;  %v761_v16 = vld [vmem:[#allocation2 + $0x1b0] sm:$0xff] }
 0x60c   :  { %v773_v17 = vpack.c.bf16 %v761_v16, %v760_v15 }
 0x60d   :  { %2061 = vrot.lane.b32.xlu0 %v2060_v19, %s2198_s0  ;;  %v763_v19 = vld [vmem:[#allocation2 + $0x1c0] sm:$0xff] }
 0x60e   :  { %v774_v21 = vpack.c.bf16 %v763_v19, %v762_v18 }
 0x610   :  { %v541_v24 = vpop.f32.mrb[8].mxu0 }
 0x611   :  { %v1906_v27 = vpop.f32.mrb[9].mxu0 }
 0x612   :  { %v544_v28 = vpop.f32.mrb[10].mxu0  ;;  %v764_v27 = vld [vmem:[#allocation2 + $0x1c8] sm:$0xff] }
 0x613   :  { %v2065_v29 = vpack.i.bf16 %v544_v28, %v541_v24  ;;  %v1907_v30 = vpop.f32.mrb[11].mxu0  ;;  %v765_v28 = vld [vmem:[#allocation2 + $0x1d0] sm:$0xff] }
 0x614   :  { %v766_v30 = vld [vmem:[#allocation2 + $0x1d8] sm:$0xff] }
 0x615   :  { %2066 = vrot.lane.b32.xlu1 %v2065_v29, %s2199_s19  ;;  %v775_v29 = vpack.c.bf16 %v765_v28, %v764_v27 }
 0x618   :  { %v549_v31 = vpop.f32.mrb[12].mxu0 }
 0x619   :  { %v1910_v32 = vpop.f32.mrb[13].mxu0 }
 0x61a   :  { %v552_v33 = vpop.f32.mrb[14].mxu0 }
 0x61b   :  { %v2070_v34 = vpack.i.bf16 %v552_v33, %v549_v31  ;;  %v1911_v35 = vpop.f32.mrb[15].mxu0  ;;  %v767_v31 = vld [vmem:[#allocation2 + $0x1e0] sm:$0xff] }
 0x61c   :  { %v776_v33 = vpack.c.bf16 %v767_v31, %v766_v30 }
 0x61d   :  { %2071 = vrot.lane.b32.xlu0 %v2070_v34, %s2200_s20 }
 0x67f   :  { %v2062_v36 = vpop.permute.xlu0 %2061 }
 0x680   :  { %v2064_v38 = vunpack.i.h.bf16 %v2062_v36  ;;  %v2063_v39 = vunpack.i.l.bf16 %v2062_v36 }
 0x682   :  { %v581_v44 = vsel %vm198_vm7, %v2297_v45, %v2064_v38  ;;  %v580_v46 = vsel %vm198_vm7, %v2295_v43, %v2063_v39 }
 0x687   :  { %v2067_v37 = vpop.permute.xlu1 %2066 }
 0x688   :  { %v2069_v40 = vunpack.i.h.bf16 %v2067_v37  ;;  %v2068_v41 = vunpack.i.l.bf16 %v2067_v37 }
 0x68a   :  { %v584_v49 = vsel %vm582_vm12, %v581_v44, %v2069_v40  ;;  %v583_v50 = vsel %vm582_vm12, %v580_v46, %v2068_v41 }
 0x68f   :  { %v2072_v42 = vpop.permute.xlu0 %2071 }
 0x690   :  { %v2074_v47 = vunpack.i.h.bf16 %v2072_v42  ;;  %v2073_v48 = vunpack.i.l.bf16 %v2072_v42 }
 0x692   :  { %v587_v52 = vsel %vm585_vm13, %v584_v49, %v2074_v47  ;;  %v586_v53 = vsel %vm585_vm13, %v583_v50, %v2073_v48 }
 0x693   :  { %v604_v55 = vpack.c.bf16 %v587_v52, %v586_v53 }
 0x695   :  { %1929 = vmatmul.mubr.bf16.vlgmr.msra.gmra.mrb[16].mxu0 %v604_v55 }
 0x696   :  { %1968 = vmatprep.mubr.msk.bf16.mxu0 %vm2197_vm8, %v2196_v10 }
 0x768   :  { %v652_v58 = vpop.f32.mrb[16].mxu0 }
 0x769   :  { %v653_v59 = vadd.f32 %v1763_v56, %v652_v58  ;;  %v1930_v60 = vpop.f32.mrb[17].mxu0 }
 0x76a   :  { %v655_v61 = vpop.f32.mrb[18].mxu0 }
 0x76b   :  { %v656_v62 = vadd.f32 %v1763_v56, %v655_v61  ;;  %v1931_v63 = vpop.f32.mrb[19].mxu0  ;;  %v2342_v0 = vmax.f32 %v653_v59, 0.0 }
 0x76d   :  { %v2344_v2 = vmax.f32 %v656_v62, 0.0 }
 0x76f   :  { %v661_v3 = vpack.c.bf16 %v2344_v2, %v2342_v0  ;;  %v2090_v38 = vpack.i.bf16 %v2344_v2, %v2342_v0 }
 0x771   :  { %v663_v4 = vsel %vm132_vm0, %v661_v3, 0 }
 0x772   :  { %1933 = vmatpush3.bf16.msra.mxu1 %v663_v4  ;;  %v1767_v4 = vld [vmem:[#allocation2 + $0x1e8] ss:$0 sm:$0xff] }
 0x773   :  { %1946 = vmatprep.subr.bf16.mxu1 %v2196_v10 }
 0x775   :  { %1935 = vmatmul.mubr.msk.bf16.vlgmr.msra.gmra.mrb[16].mxu1 %vm486_vm11, %v2302_v51  ;;  %v755_v51 = vld [vmem:[#allocation2 + $0x180] sm:$0xff] }
 0x776   :  { %1938 = vmatprep.mubr.msk.bf16.mxu1 %vm2197_vm8, %v2196_v10  ;;  %1947 = vmatpush3.bf16.msra.mxu1 %v769_v8  ;;  %v770_v9 = vpack.c.bf16 %v755_v51, %v754_v7 }
 0x777   :  { %1948 = vmatprep.subr.bf16.mxu1 %v2196_v10 }
 0x77a   :  { %1949 = vmatpush3.bf16.msra.mxu1 %v770_v9 }
 0x77b   :  { %1950 = vmatprep.subr.bf16.mxu1 %v2196_v10 }
 0x77d   :  { %1939 = vmatmul.mubr.msk.bf16.gmra.mrb[20].mxu1 %vm486_vm11, %v2309_v54  ;;  %v757_v54 = vld [vmem:[#allocation2 + $0x190] sm:$0xff] }
 0x77e   :  { %1942 = vmatprep.mubr.msk.bf16.mxu1 %vm2197_vm8, %v2196_v10  ;;  %v771_v12 = vpack.c.bf16 %v757_v54, %v756_v11 }
 0x780   :  { %1951 = vmatpush3.bf16.msra.mxu1 %v771_v12 }
 0x781   :  { %1952 = vmatprep.subr.bf16.mxu1 %v2196_v10 }
 0x785   :  { %1943 = vmatmul.mubr.msk.bf16.gmra.mrb[24].mxu1 %vm486_vm11, %v2315_v57  ;;  %v758_v57 = vld [vmem:[#allocation2 + $0x198] sm:$0xff] }
 0x786   :  { %1962 = vmatprep.mubr.msk.bf16.mxu1 %vm2197_vm8, %v2196_v10  ;;  %v772_v14 = vpack.c.bf16 %v759_v13, %v758_v57 }
 0x788   :  { %1953 = vmatpush3.bf16.msra.mxu1 %v772_v14 }
 0x789   :  { %1954 = vmatprep.subr.bf16.mxu1 %v2196_v10 }
 0x78c   :  { %1955 = vmatpush3.bf16.msra.mxu1 %v773_v17 }
 0x78d   :  { %1956 = vmatprep.subr.bf16.mxu1 %v2196_v10 }
 0x790   :  { %1957 = vmatpush3.bf16.msra.mxu1 %v774_v21 }
 0x791   :  { %1958 = vmatprep.subr.bf16.mxu1 %v2196_v10 }
 0x794   :  { %1959 = vmatpush3.bf16.msra.mxu1 %v775_v29 }
 0x795   :  { %1960 = vmatprep.subr.bf16.mxu1 %v2196_v10 }
 0x798   :  { %1961 = vmatpush3.bf16.msra.mxu1 %v776_v33  ;;  %v962_v33 = vld [vmem:[#allocation2 + $0x228] sm:$0xf] }
 0x848   :  { %v699_v20 = vpop.f32.mrb[16].mxu1 }
 0x849   :  { %v1936_v22 = vpop.f32.mrb[17].mxu1 }
 0x84a   :  { %v702_v23 = vpop.f32.mrb[18].mxu1 }
 0x84b   :  { %v2075_v24 = vpack.i.bf16 %v702_v23, %v699_v20  ;;  %v1937_v26 = vpop.f32.mrb[19].mxu1  ;;  %v845_v20 = vld [vmem:[#allocation2 + $0x1f0] sm:$0xff] }
 0x84c   :  { %v846_v23 = vpack.c.bf16 %v845_v20, %v845_v20  ;;  %v960_v26 = vld [vmem:[#allocation2 + $0x218] sm:$0xff] }
 0x84d   :  { %2076 = vrot.lane.b32.xlu1 %v2075_v24, %s2198_s0  ;;  %v959_v24 = vld [vmem:[#allocation2 + $0x210] sm:$0xff] }
 0x84e   :  { %v963_v27 = vpack.c.bf16 %v960_v26, %v959_v24  ;;  %v1103_v24 = vld [vmem:[#allocation2 + $0x290] sm:$0xff] }
 0x850   :  { %v707_v32 = vpop.f32.mrb[20].mxu1 }
 0x851   :  { %v1940_v34 = vpop.f32.mrb[21].mxu1 }
 0x852   :  { %v710_v35 = vpop.f32.mrb[22].mxu1 }
 0x853   :  { %v2080_v36 = vpack.i.bf16 %v710_v35, %v707_v32  ;;  %v1941_v37 = vpop.f32.mrb[23].mxu1  ;;  %v961_v32 = vld [vmem:[#allocation2 + $0x220] sm:$0xff] }
 0x854   :  { %v894_v37 = vld [vmem:[#allocation2 + $0x1f8] sm:$0xff] }
 0x855   :  { %2081 = vrot.lane.b32.xlu0 %v2080_v36, %s2199_s19  ;;  %v964_v36 = vpack.c.bf16 %v962_v33, %v961_v32  ;;  %v1277_v32 = vld [vmem:[#allocation5 + $0x138] sm:$0xff]  ;;  %v1279_v33 = vld [vmem:[#allocation5 + $0x148] sm:$0xff] }
 0x858   :  { %v715_v39 = vpop.f32.mrb[24].mxu1 }
 0x859   :  { %2091 = vrot.lane.b32.xlu0 %v2090_v38, %s2198_s0  ;;  %v1944_v40 = vpop.f32.mrb[25].mxu1  ;;  %v895_v38 = vld [vmem:[#allocation2 + $0x200] sm:$0xff] }
 0x85a   :  { %v718_v41 = vpop.f32.mrb[26].mxu1  ;;  %v897_v40 = vpack.c.bf16 %v895_v38, %v894_v37  ;;  %v1278_v37 = vld [vmem:[#allocation5 + $0x140] sm:$0xff]  ;;  %v1281_v38 = vld [vmem:[#allocation5 + $0x158] sm:$0xff] }
 0x85b   :  { %v2085_v42 = vpack.i.bf16 %v718_v41, %v715_v39  ;;  %v1945_v44 = vpop.f32.mrb[27].mxu1  ;;  %v896_v39 = vld [vmem:[#allocation2 + $0x208] sm:$0xff] }
 0x85c   :  { %v898_v41 = vpack.c.bf16 %v896_v39, %v896_v39  ;;  %v1037_v44 = vld [vmem:[#allocation2 + $0x238] sm:$0xff]  ;;  %v1283_v39 = vld [vmem:[#allocation5 + $0x168] sm:$0xff] }
 0x85d   :  { %2086 = vrot.lane.b32.xlu1 %v2085_v42, %s2200_s20  ;;  %v1036_v42 = vld [vmem:[#allocation2 + $0x230] sm:$0xff] }
 0x8bf   :  { %v2077_v46 = vpop.permute.xlu1 %2076 }
 0x8c0   :  { %v2079_v48 = vunpack.i.h.bf16 %v2077_v46  ;;  %v2078_v49 = vunpack.i.l.bf16 %v2077_v46  ;;  %v1045_v46 = vpack.c.bf16 %v1037_v44, %v1036_v42  ;;  %v1280_v42 = vld [vmem:[#allocation5 + $0x150] sm:$0xff]  ;;  %v1282_v44 = vld [vmem:[#allocation5 + $0x160] sm:$0xff] }
 0x8c2   :  { %v747_v55 = vsel %vm198_vm7, %v2344_v2, %v2079_v48  ;;  %v746_v56 = vsel %vm198_vm7, %v2342_v0, %v2078_v49  ;;  %v1039_v48 = vld [vmem:[#allocation2 + $0x248] sm:$0xff] }
 0x8c7   :  { %v2082_v47 = vpop.permute.xlu0 %2081 }
 0x8c8   :  { %v2084_v50 = vunpack.i.h.bf16 %v2082_v47  ;;  %v2083_v52 = vunpack.i.l.bf16 %v2082_v47  ;;  %v1038_v47 = vld [vmem:[#allocation2 + $0x240] sm:$0xff] }
 0x8c9   :  { %v1046_v49 = vpack.c.bf16 %v1039_v48, %v1038_v47  ;;  %v1287_v47 = vld [vmem:[#allocation5 + $0x188] sm:$0xff]  ;;  %v1433_v48 = vpack.c.bf16 %v1282_v44, %v1280_v42  ;;  %v1309_v42 = vld [vmem:[#allocation5 + $0x238] sm:$0xff] }
 0x8ca   :  { %v749_v60 = vsel %vm582_vm12, %v747_v55, %v2084_v50  ;;  %v748_v61 = vsel %vm582_vm12, %v746_v56, %v2083_v52  ;;  %v1040_v50 = vld [vmem:[#allocation2 + $0x250] sm:$0xff]  ;;  %v1041_v52 = vld [vmem:[#allocation2 + $0x258] sm:$0xff]  ;;  %v1042_v55 = vld [vmem:[#allocation2 + $0x260] sm:$0xff] }
 0x8cb   :  { %v2092_v54 = vpop.permute.xlu0 %2091  ;;  %v1043_v56 = vld [vmem:[#allocation2 + $0x268] sm:$0xff]  ;;  %v1311_v44 = vld [vmem:[#allocation5 + $0x248] sm:$0xff] }
 0x8cc   :  { %v2094_v12 = vunpack.i.h.bf16 %v2092_v54  ;;  %v2093_v57 = vunpack.i.l.bf16 %v2092_v54 }
 0x8ce   :  { %v842_v16 = vsel %vm198_vm7, %v2297_v45, %v2094_v12  ;;  %v841_v17 = vsel %vm198_vm7, %v2295_v43, %v2093_v57  ;;  %v1100_v12 = vld [vmem:[#allocation2 + $0x278] sm:$0xff]  ;;  %v1101_v57 = vld [vmem:[#allocation2 + $0x280] sm:$0xff] }
 0x8cf   :  { %v2087_v53 = vpop.permute.xlu1 %2086 }
 0x8d0   :  { %v2089_v58 = vunpack.i.h.bf16 %v2087_v53  ;;  %v2088_v59 = vunpack.i.l.bf16 %v2087_v53  ;;  %v1047_v53 = vpack.c.bf16 %v1041_v52, %v1040_v50  ;;  %v1286_v52 = vld [vmem:[#allocation5 + $0x180] sm:$0xff] }
 0x8d2   :  { %v751_v62 = vsel %vm585_vm13, %v749_v60, %v2089_v58  ;;  %v750_v63 = vsel %vm585_vm13, %v748_v61, %v2088_v59  ;;  %v1048_v58 = vpack.c.bf16 %v1043_v56, %v1042_v55  ;;  %v1183_v55 = vld [vmem:[#allocation5 + $0x10] sm:$0xff]  ;;  %v1289_v56 = vld [vmem:[#allocation5 + $0x198] sm:$0xff] }
 0x8d3   :  { %v768_v3 = vpack.c.bf16 %v751_v62, %v750_v63 }
 0x8d5   :  { %1963 = vmatmul.mubr.bf16.vlgmr.msra.gmra.mrb[28].mxu1 %v768_v3 }
 0x8d6   :  { %1980 = vmatprep.mubr.msk.bf16.mxu1 %vm900_vm14, %v963_v27 }
 0x9a8   :  { %v816_v5 = vpop.f32.mrb[28].mxu1 }
 0x9a9   :  { %v817_v6 = vadd.f32 %v1767_v4, %v816_v5  ;;  %v1964_v7 = vpop.f32.mrb[29].mxu1 }
 0x9aa   :  { %v819_v2 = vpop.f32.mrb[30].mxu1 }
 0x9ab   :  { %v820_v8 = vadd.f32 %v1767_v4, %v819_v2  ;;  %v1965_v51 = vpop.f32.mrb[31].mxu1  ;;  %v823_v0 = vmax.f32 %v817_v6, 0.0 }
 0x9ad   :  { %v824_v9 = vmax.f32 %v820_v8, 0.0 }
 0x9af   :  { %v2095_v11 = vpack.i.bf16 %v824_v9, %v823_v0 }
 0x9b1   :  { %2096 = vrot.lane.b32.xlu1 %v2095_v11, %s2199_s19 }
 0xa23   :  { %v2097_v13 = vpop.permute.xlu1 %2096 }
 0xa24   :  { %v2099_v14 = vunpack.i.h.bf16 %v2097_v13  ;;  %v2098_v15 = vunpack.i.l.bf16 %v2097_v13  ;;  %v1104_v13 = vpack.c.bf16 %v1101_v57, %v1100_v12  ;;  %v1292_v57 = vld [vmem:[#allocation5 + $0x1b0] sm:$0xff] }
 0xa26   :  { %v844_v18 = vsel %vm582_vm12, %v842_v16, %v2099_v14  ;;  %v843_v19 = vsel %vm582_vm12, %v841_v17, %v2098_v15  ;;  %v1773_v14 = vld [vmem:[#allocation2 + $0x270] ss:$0 sm:$0xff] }
 0xa27   :  { %v847_v21 = vpack.c.bf16 %v844_v18, %v843_v19 }
 0xa29   :  { %v852_v22 = vsel %vm132_vm0, %v847_v21, 0  ;;  %vm1107_vm0 = vcmask 97280  }
 0xa2a   :  { %1967 = vmatpush3.bf16.msra.mxu0 %v852_v22 }
 0xa2d   :  { %1969 = vmatmul.mubr.msk.bf16.vlgmr.msra.gmra.mrb[20].mxu0 %vm486_vm11, %v846_v23  ;;  %v1102_v23 = vld [vmem:[#allocation2 + $0x288] sm:$0xff] }
 0xa2e   :  { %1974 = vmatprep.mubr.msk.bf16.mxu0 %vm900_vm14, %v897_v40 }
 0xb00   :  { %v888_v45 = vpop.f32.mrb[20].mxu0 }
 0xb01   :  { %v899_v43 = vpack.c.bf16 %v888_v45, %v888_v45  ;;  %v1970_v28 = vpop.f32.mrb[21].mxu0  ;;  %v1105_v45 = vpack.c.bf16 %v1103_v24, %v1102_v23  ;;  %v1298_v24 = vld [vmem:[#allocation5 + $0x1e0] sm:$0xff] }
 0xb02   :  { %v891_v29 = vpop.f32.mrb[22].mxu0  ;;  %v1275_v28 = vld [vmem:[#allocation5 + $0x128] sm:$0xff] }
 0xb03   :  { %966 = vrot.lane.b32.xlu0 %v899_v43, %s2199_s19  ;;  %v1971_v30 = vpop.f32.mrb[23].mxu0  ;;  %2035 = vmatprep.subr.msk.bf16.mxu0 %vm907_vm15, %v899_v43  ;;  %v909_v31 = vsel %vm907_vm15, %v899_v43, 0  ;;  %v1273_v43 = vld [vmem:[#allocation5 + $0x118] sm:$0xff]  ;;  %v1272_v29 = vld [vmem:[#allocation5 + $0x110] sm:$0xff] }
 0xb04   :  { %1973 = vmatpush3.bf16.msra.mxu0 %v909_v31  ;;  %v1430_v30 = vpack.c.bf16 %v1275_v28, %v1273_v43  ;;  %v1274_v31 = vld [vmem:[#allocation5 + $0x120] sm:$0xff]  ;;  %v1303_v43 = vld [vmem:[#allocation5 + $0x208] sm:$0xff] }
 0xb05   :  { %1984 = vmatprep.subr.bf16.mxu0 %v2196_v10 }
 0xb07   :  { %1975 = vmatmul.mubr.msk.bf16.vlgmr.msra.gmra.mrb[24].mxu0 %vm900_vm14, %v898_v41  ;;  %v1434_v41 = vpack.c.bf16 %v1283_v39, %v1281_v38 }
 0xb08   :  { %1985 = vmatpush3.bf16.msra.mxu0 %v1045_v46  ;;  %1992 = vmatprep.mubr.msk.bf16.mxu0 %vm2197_vm8, %v2196_v10  ;;  %v1285_v46 = vld [vmem:[#allocation5 + $0x178] sm:$0xff] }
 0xb09   :  { %1986 = vmatprep.subr.bf16.mxu0 %v2196_v10  ;;  %v1436_v50 = vpack.c.bf16 %v1287_v47, %v1285_v46  ;;  %v1448_v47 = vpack.c.bf16 %v1311_v44, %v1309_v42 }
 0xb0c   :  { %1987 = vmatpush3.bf16.msra.mxu0 %v1046_v49  ;;  %v1284_v49 = vld [vmem:[#allocation5 + $0x170] sm:$0xff] }
 0xb0d   :  { %1988 = vmatprep.subr.bf16.mxu0 %v2196_v10 }
 0xb10   :  { %1989 = vmatpush3.bf16.msra.mxu0 %v1047_v53  ;;  %v1182_v53 = vld [vmem:[#allocation5] sm:$0xff] }
 0xb11   :  { %1990 = vmatprep.subr.bf16.mxu0 %v2196_v10 }
 0xb14   :  { %1991 = vmatpush3.bf16.msra.mxu0 %v1048_v58  ;;  %v1291_v58 = vld [vmem:[#allocation5 + $0x1a8] sm:$0xff] }
 0xb15   :  { %1521 = vmatprep.subr.bf16.mxu0 %v1430_v30 }
 0xb75   :  { %v967_v34 = vpop.permute.xlu0 %966 }
 0xb76   :  { %v975_v35 = vsel %vm907_vm15, %v967_v34, 0  ;;  %2036 = vmatprep.subr.msk.bf16.mxu1 %vm907_vm15, %v967_v34  ;;  %v1429_v34 = vpack.c.bf16 %v1274_v31, %v1272_v29  ;;  %v1300_v29 = vld [vmem:[#allocation5 + $0x1f0] sm:$0xff] }
 0xb77   :  { %1979 = vmatpush3.bf16.msra.mxu1 %v975_v35  ;;  %v1432_v35 = vpack.c.bf16 %v1279_v33, %v1277_v32  ;;  %v1302_v32 = vld [vmem:[#allocation5 + $0x200] sm:$0xff] }
 0xb78   :  { %v1192_v33 = vld [vmem:[#allocation5 + $0xa0] sm:$0xff] }
 0xb7a   :  { %1981 = vmatmul.mubr.msk.bf16.vlgmr.msra.gmra.mrb[32].mxu1 %vm900_vm14, %v964_v36  ;;  %v1276_v36 = vld [vmem:[#allocation5 + $0x130] sm:$0xff] }
 0xb7b   :  { %1998 = vmatprep.mubr.msk.bf16.mxu1 %vm1107_vm0, %v1104_v13  ;;  %v1431_v40 = vpack.c.bf16 %v1278_v37, %v1276_v36  ;;  %v1307_v36 = vld [vmem:[#allocation5 + $0x228] sm:$0xff]  ;;  %v1443_v37 = vpack.c.bf16 %v1302_v32, %v1300_v29  ;;  %v1333_v29 = vld [vmem:[#allocation5 + $0x2f8] sm:$0xff]  ;;  %v1332_v32 = vld [vmem:[#allocation5 + $0x2f0] sm:$0xff] }
 0xbda   :  { %v2404_v3 = vpop.f32.mrb[24].mxu0 }
 0xbdb   :  { %v2406_v4 = vpop.f32.mrb[25].mxu0 }
 0xbdc   :  { %v1977_v5 = vpop.f32.mrb[26].mxu0 }
 0xbdd   :  { %v2408_v6 = vpop.f32.mrb[27].mxu0 }
 0xbde   :  { %v1249_v7 = vsub.f32 %v2406_v4, %v2408_v6  ;;  %v2414_v2 = vmul.f32 %v2408_v6, %v2406_v4 }
 0xc4d   :  { %v1982_v59 = vpop.f32.mrb[32].mxu1 }
 0xc4e   :  { %v1011_v60 = vpop.f32.mrb[33].mxu1 }
 0xc4f   :  { %v1983_v61 = vpop.f32.mrb[34].mxu1 }
 0xc50   :  { %v2100_v62 = vpack.i.bf16 %v1983_v61, %v1982_v59  ;;  %v1014_v63 = vpop.f32.mrb[35].mxu1  ;;  %v1199_v59 = vpack.c.bf16 %v1183_v55, %v1182_v53  ;;  %v1185_v61 = vld [vmem:[#allocation5 + $0x30] sm:$0xff] }
 0xc52   :  { %2101 = vrot.lane.b32.xlu1 %v2100_v62, %s2198_s0  ;;  %v1435_v62 = vpack.c.bf16 %v1286_v52, %v1284_v49  ;;  %v1310_v49 = vld [vmem:[#allocation5 + $0x240] sm:$0xff]  ;;  %v1315_v52 = vld [vmem:[#allocation5 + $0x268] sm:$0xff] }
 0xcc4   :  { %v2102_v8 = vpop.permute.xlu1 %2101 }
 0xcc5   :  { %v2104_v51 = vunpack.i.h.bf16 %v2102_v8  ;;  %v2103_v0 = vunpack.i.l.bf16 %v2102_v8  ;;  %v1438_v8 = vpack.c.bf16 %v1291_v58, %v1289_v56  ;;  %v1312_v56 = vld [vmem:[#allocation5 + $0x250] sm:$0xff]  ;;  %v1314_v58 = vld [vmem:[#allocation5 + $0x260] sm:$0xff] }
 0xcc7   :  { %v1034_v9 = vsel %vm198_vm7, %v1011_v60, %v2103_v0  ;;  %v1035_v11 = vsel %vm198_vm7, %v1014_v63, %v2104_v51  ;;  %v1184_v60 = vld [vmem:[#allocation5 + $0x20] sm:$0xff]  ;;  %v1288_v63 = vld [vmem:[#allocation5 + $0x190] sm:$0xff] }
 0xcc8   :  { %v1044_v54 = vpack.c.bf16 %v1035_v11, %v1034_v9  ;;  %v1200_v5 = vpack.c.bf16 %v1185_v61, %v1184_v60  ;;  %v1290_v51 = vld [vmem:[#allocation5 + $0x1a0] sm:$0xff]  ;;  %v1187_v9 = vld [vmem:[#allocation5 + $0x50] sm:$0xff]  ;;  %v1293_v11 = vld [vmem:[#allocation5 + $0x1b8] sm:$0xff]  ;;  %v1449_v61 = vpack.c.bf16 %v1314_v58, %v1312_v56 }
 0xcc9   :  { %v1186_v0 = vld [vmem:[#allocation5 + $0x40] sm:$0xff]  ;;  %v1437_v12 = vpack.c.bf16 %v1290_v51, %v1288_v63  ;;  %v1319_v60 = vld [vmem:[#allocation5 + $0x288] sm:$0xff]  ;;  %v1316_v63 = vld [vmem:[#allocation5 + $0x270] sm:$0xff] }
 0xcca   :  { %1993 = vmatmul.mubr.msk.bf16.vlgmr.msra.gmra.mrb[28].mxu0 %vm582_vm12, %v1044_v54  ;;  %v1295_v54 = vld [vmem:[#allocation5 + $0x1c8] sm:$0xff]  ;;  %v1201_v13 = vpack.c.bf16 %v1187_v9, %v1186_v0  ;;  %v1338_v58 = vld [vmem:[#allocation5 + $0x320] sm:$0xff] }
 0xccb   :  { %1522 = vmatpush1.bf16.msra.mxu0 %v1429_v34  ;;  %v1193_v34 = vld [vmem:[#allocation5 + $0xb0] sm:$0xff]  ;;  %v1323_v51 = vld [vmem:[#allocation5 + $0x2a8] sm:$0xff] }
 0xccc   :  { %1523 = vmatprep.subr.bf16.mxu0 %v1432_v35  ;;  %v1305_v35 = vld [vmem:[#allocation5 + $0x218] sm:$0xff]  ;;  %v1204_v38 = vpack.c.bf16 %v1193_v34, %v1192_v33  ;;  %v1334_v33 = vld [vmem:[#allocation5 + $0x300] sm:$0xff] }
 0xccd   :  { %v1446_v39 = vpack.c.bf16 %v1307_v36, %v1305_v35  ;;  %v1459_v34 = vpack.c.bf16 %v1334_v33, %v1332_v32  ;;  %v1404_v32 = vld [vmem:[#allocation5 + $0x530] sm:$0xff] }
 0xccf   :  { %1524 = vmatpush1.bf16.msra.mxu0 %v1431_v40  ;;  %v1304_v40 = vld [vmem:[#allocation5 + $0x210] sm:$0xff] }
 0xcd0   :  { %1525 = vmatprep.subr.bf16.mxu0 %v1434_v41  ;;  %v1306_v41 = vld [vmem:[#allocation5 + $0x220] sm:$0xff] }
 0xcd1   :  { %v1445_v46 = vpack.c.bf16 %v1306_v41, %v1304_v40 }
 0xcd3   :  { %1526 = vmatpush1.bf16.msra.mxu0 %v1433_v48  ;;  %v1308_v48 = vld [vmem:[#allocation5 + $0x230] sm:$0xff] }
 0xcd4   :  { %1527 = vmatprep.subr.bf16.mxu0 %v1436_v50  ;;  %v1313_v50 = vld [vmem:[#allocation5 + $0x258] sm:$0xff]  ;;  %v1447_v53 = vpack.c.bf16 %v1310_v49, %v1308_v48 }
 0xcd5   :  { %v1450_v55 = vpack.c.bf16 %v1315_v52, %v1313_v50  ;;  %v1337_v52 = vld [vmem:[#allocation5 + $0x318] sm:$0xff] }
 0xcd7   :  { %1528 = vmatpush1.bf16.msra.mxu0 %v1435_v62 }
 0xcd8   :  { %1529 = vmatprep.subr.bf16.mxu0 %v1438_v8  ;;  %v1321_v8 = vld [vmem:[#allocation5 + $0x298] sm:$0xff] }
 0xcd9   :  { %v1454_v9 = vpack.c.bf16 %v1323_v51, %v1321_v8  ;;  %v1347_v8 = vld [vmem:[#allocation5 + $0x368] sm:$0xff] }
 0xcdb   :  { %1530 = vmatpush1.bf16.msra.mxu0 %v1437_v12 }
 0xd9d   :  { %v1091_v15 = vpop.f32.mrb[28].mxu0 }
 0xd9e   :  { %v1092_v16 = vadd.f32 %v1773_v14, %v1091_v15  ;;  %v1994_v17 = vpop.f32.mrb[29].mxu0  ;;  %v1294_v15 = vld [vmem:[#allocation5 + $0x1c0] sm:$0xff] }
 0xd9f   :  { %v1094_v18 = vpop.f32.mrb[30].mxu0  ;;  %v1189_v17 = vld [vmem:[#allocation5 + $0x70] sm:$0xff] }
 0xda0   :  { %v1095_v19 = vadd.f32 %v1773_v14, %v1094_v18  ;;  %v1995_v20 = vpop.f32.mrb[31].mxu0  ;;  %v1098_v21 = vmax.f32 %v1092_v16, 0.0  ;;  %v1440_v14 = vpack.c.bf16 %v1295_v54, %v1293_v11  ;;  %v1188_v16 = vld [vmem:[#allocation5 + $0x60] sm:$0xff]  ;;  %v1297_v18 = vld [vmem:[#allocation5 + $0x1d8] sm:$0xff]  ;;  %v1320_v11 = vld [vmem:[#allocation5 + $0x290] sm:$0xff] }
 0xda1   :  { %v1439_v20 = vpack.c.bf16 %v1294_v15, %v1292_v57  ;;  %v1322_v54 = vld [vmem:[#allocation5 + $0x2a0] sm:$0xff] }
 0xda2   :  { %v1099_v22 = vmax.f32 %v1095_v19, 0.0  ;;  %v1299_v19 = vld [vmem:[#allocation5 + $0x1e8] sm:$0xff]  ;;  %1531 = vmatprep.subr.bf16.mxu0 %v1440_v14  ;;  %v1453_v12 = vpack.c.bf16 %v1322_v54, %v1320_v11  ;;  %v1194_v57 = vld [vmem:[#allocation5 + $0xc0] sm:$0xff]  ;;  %v1325_v14 = vld [vmem:[#allocation5 + $0x2b8] sm:$0xff] }
 0xda3   :  { %v1442_v23 = vpack.c.bf16 %v1299_v19, %v1297_v18  ;;  %1532 = vmatpush1.bf16.msra.mxu0 %v1439_v20  ;;  %v1326_v18 = vld [vmem:[#allocation5 + $0x2c0] sm:$0xff]  ;;  %v1349_v54 = vld [vmem:[#allocation5 + $0x378] sm:$0xff] }
 0xda4   :  { %v1106_v26 = vpack.c.bf16 %v1099_v22, %v1098_v21  ;;  %v1296_v21 = vld [vmem:[#allocation5 + $0x1d0] sm:$0xff]  ;;  %v1202_v22 = vpack.c.bf16 %v1189_v17, %v1188_v16  ;;  %v1327_v16 = vld [vmem:[#allocation5 + $0x2c8] sm:$0xff]  ;;  %v1346_v11 = vld [vmem:[#allocation5 + $0x360] sm:$0xff] }
 0xda5   :  { %v1441_v28 = vpack.c.bf16 %v1298_v24, %v1296_v21  ;;  %1533 = vmatprep.subr.bf16.mxu0 %v1442_v23  ;;  %v1324_v17 = vld [vmem:[#allocation5 + $0x2b0] sm:$0xff]  ;;  %v1456_v19 = vpack.c.bf16 %v1327_v16, %v1325_v14  ;;  %v1196_v21 = vld [vmem:[#allocation5 + $0xe0] sm:$0xff]  ;;  %v1329_v23 = vld [vmem:[#allocation5 + $0x2d8] sm:$0xff] }
 0xda6   :  { %2037 = vmatprep.subr.msk.bf16.mxu1 %vm1114_vm1, %v1106_v26  ;;  %v1116_v27 = vsel %vm1114_vm1, %v1106_v26, 0  ;;  %v1190_v26 = vld [vmem:[#allocation5 + $0x80] sm:$0xff]  ;;  %v1455_v20 = vpack.c.bf16 %v1326_v18, %v1324_v17  ;;  %v1348_v14 = vld [vmem:[#allocation5 + $0x370] sm:$0xff]  ;;  %v1353_v16 = vld [vmem:[#allocation5 + $0x398] sm:$0xff] }
 0xda7   :  { %1997 = vmatpush3.bf16.msra.mxu1 %v1116_v27  ;;  %v1191_v27 = vld [vmem:[#allocation5 + $0x90] sm:$0xff]  ;;  %1534 = vmatpush1.bf16.msra.mxu0 %v1441_v28  ;;  %v1355_v17 = vld [vmem:[#allocation5 + $0x3a8] sm:$0xff] }
 0xda8   :  { %2002 = vmatprep.subr.bf16.mxu1 %v2196_v10  ;;  %v1203_v30 = vpack.c.bf16 %v1191_v27, %v1190_v26  ;;  %v1331_v26 = vld [vmem:[#allocation5 + $0x2e8] sm:$0xff]  ;;  %v1328_v27 = vld [vmem:[#allocation5 + $0x2d0] sm:$0xff] }
 0xdaa   :  { %1999 = vmatmul.mubr.msk.bf16.vlgmr.msra.gmra.mrb[36].mxu1 %vm1107_vm0, %v1105_v45  ;;  %v1301_v45 = vld [vmem:[#allocation5 + $0x1f8] sm:$0xff] }
 0xdab   :  { %2018 = vmatprep.mubr.msk.bf16.mxu1 %vm2197_vm8, %v2196_v10  ;;  %2003 = vmatpush3.bf16.msra.mxu1 %v1199_v59  ;;  %v1444_v31 = vpack.c.bf16 %v1303_v43, %v1301_v45  ;;  %v1317_v59 = vld [vmem:[#allocation5 + $0x278] sm:$0xff]  ;;  %v1330_v45 = vld [vmem:[#allocation5 + $0x2e0] sm:$0xff]  ;;  %v1458_v43 = vpack.c.bf16 %v1331_v26, %v1329_v23  ;;  %v1359_v26 = vld [vmem:[#allocation5 + $0x3c8] sm:$0xff] }
 0xdac   :  { %2004 = vmatprep.subr.bf16.mxu1 %v2196_v10  ;;  %v1452_v62 = vpack.c.bf16 %v1319_v60, %v1317_v59  ;;  %v1457_v28 = vpack.c.bf16 %v1330_v45, %v1328_v27  ;;  %v1341_v59 = vld [vmem:[#allocation5 + $0x338] sm:$0xff]  ;;  %v1343_v60 = vld [vmem:[#allocation5 + $0x348] sm:$0xff]  ;;  %v1400_v45 = vld [vmem:[#allocation5 + $0x510] sm:$0xff] }
 0xdad   :  { %1535 = vmatprep.subr.bf16.mxu0 %v1444_v31  ;;  %v1401_v23 = vld [vmem:[#allocation5 + $0x518] sm:$0xff] }
 0xdae   :  { %1536 = vmatpush1.bf16.msra.mxu0 %v1443_v37 }
 0xdaf   :  { %2005 = vmatpush3.bf16.msra.mxu1 %v1200_v5  ;;  %1537 = vmatprep.subr.bf16.mxu0 %v1446_v39  ;;  %v1318_v5 = vld [vmem:[#allocation5 + $0x280] sm:$0xff] }
 0xdb0   :  { %2006 = vmatprep.subr.bf16.mxu1 %v2196_v10  ;;  %v1451_v0 = vpack.c.bf16 %v1318_v5, %v1316_v63  ;;  %v1342_v63 = vld [vmem:[#allocation5 + $0x340] sm:$0xff]  ;;  %v1345_v5 = vld [vmem:[#allocation5 + $0x358] sm:$0xff] }
 0xdb2   :  { %1538 = vmatpush1.bf16.msra.mxu0 %v1445_v46 }
 0xdb3   :  { %2007 = vmatpush3.bf16.msra.mxu1 %v1201_v13  ;;  %1539 = vmatprep.subr.bf16.mxu0 %v1448_v47  ;;  %v1195_v13 = vld [vmem:[#allocation5 + $0xd0] sm:$0xff] }
 0xdb4   :  { %2008 = vmatprep.subr.bf16.mxu1 %v2196_v10  ;;  %v1205_v15 = vpack.c.bf16 %v1195_v13, %v1194_v57 }
 0xdb6   :  { %1540 = vmatpush1.bf16.msra.mxu0 %v1447_v53  ;;  %v1339_v53 = vld [vmem:[#allocation5 + $0x328] sm:$0xff] }
 0xdb7   :  { %2009 = vmatpush3.bf16.msra.mxu1 %v1202_v22  ;;  %1541 = vmatprep.subr.bf16.mxu0 %v1450_v55  ;;  %v1197_v22 = vld [vmem:[#allocation5 + $0xf0] sm:$0xff]  ;;  %v1462_v56 = vpack.c.bf16 %v1339_v53, %v1337_v52  ;;  %v1413_v52 = vld [vmem:[#allocation5 + $0x578] sm:$0xff]  ;;  %v1415_v53 = vld [vmem:[#allocation5 + $0x588] sm:$0xff] }
 0xdb8   :  { %2010 = vmatprep.subr.bf16.mxu1 %v2196_v10  ;;  %v1206_v24 = vpack.c.bf16 %v1197_v22, %v1196_v21  ;;  %v1336_v55 = vld [vmem:[#allocation5 + $0x310] sm:$0xff]  ;;  %v1470_v21 = vpack.c.bf16 %v1355_v17, %v1353_v16  ;;  %v1357_v22 = vld [vmem:[#allocation5 + $0x3b8] sm:$0xff]  ;;  %v1370_v16 = vld [vmem:[#allocation5 + $0x420] sm:$0xff] }
 0xdb9   :  { %v1472_v33 = vpack.c.bf16 %v1359_v26, %v1357_v22  ;;  %v1373_v17 = vld [vmem:[#allocation5 + $0x438] sm:$0xff]  ;;  %v1422_v22 = vld [vmem:[#allocation5 + $0x5c0] sm:$0xff]  ;;  %v1372_v26 = vld [vmem:[#allocation5 + $0x430] sm:$0xff] }
 0xdba   :  { %1542 = vmatpush1.bf16.msra.mxu0 %v1449_v61  ;;  %v1464_v61 = vpack.c.bf16 %v1343_v60, %v1341_v59  ;;  %v1414_v59 = vld [vmem:[#allocation5 + $0x580] sm:$0xff] }
 0xdbb   :  { %2011 = vmatpush3.bf16.msra.mxu1 %v1203_v30  ;;  %1543 = vmatprep.subr.bf16.mxu0 %v1452_v62  ;;  %v1335_v30 = vld [vmem:[#allocation5 + $0x308] sm:$0xff]  ;;  %v1340_v62 = vld [vmem:[#allocation5 + $0x330] sm:$0xff] }
 0xdbc   :  { %2012 = vmatprep.subr.bf16.mxu1 %v2196_v10  ;;  %v1460_v31 = vpack.c.bf16 %v1335_v30, %v1333_v29  ;;  %v1463_v51 = vpack.c.bf16 %v1342_v63, %v1340_v62  ;;  %v1405_v30 = vld [vmem:[#allocation5 + $0x538] sm:$0xff]  ;;  %v1364_v63 = vld [vmem:[#allocation5 + $0x3f0] sm:$0xff] }
 0xdbe   :  { %1544 = vmatpush1.bf16.msra.mxu0 %v1451_v0  ;;  %v1466_v0 = vpack.c.bf16 %v1347_v8, %v1345_v5  ;;  %v1366_v5 = vld [vmem:[#allocation5 + $0x400] sm:$0xff]  ;;  %v1369_v8 = vld [vmem:[#allocation5 + $0x418] sm:$0xff] }
 0xdbf   :  { %2013 = vmatpush3.bf16.msra.mxu1 %v1204_v38  ;;  %1545 = vmatprep.subr.bf16.mxu0 %v1454_v9  ;;  %v1250_v38 = vand.u32 2147483647, %v1249_v7  ;;  %v1344_v9 = vld [vmem:[#allocation5 + $0x350] sm:$0xff] }
 0xdc0   :  { %2014 = vmatprep.subr.bf16.mxu1 %v2196_v10  ;;  %v1465_v57 = vpack.c.bf16 %v1346_v11, %v1344_v9  ;;  %v1416_v11 = vld [vmem:[#allocation5 + $0x590] sm:$0xff] }
 0xdc2   :  { %1546 = vmatpush1.bf16.msra.mxu0 %v1453_v12  ;;  %v1351_v12 = vld [vmem:[#allocation5 + $0x388] sm:$0xff] }
 0xdc3   :  { %2015 = vmatpush3.bf16.msra.mxu1 %v1205_v15  ;;  %1547 = vmatprep.subr.bf16.mxu0 %v1456_v19  ;;  %v1468_v13 = vpack.c.bf16 %v1351_v12, %v1349_v54  ;;  %v1350_v15 = vld [vmem:[#allocation5 + $0x380] sm:$0xff]  ;;  %v1352_v19 = vld [vmem:[#allocation5 + $0x390] sm:$0xff]  ;;  %v1421_v12 = vld [vmem:[#allocation5 + $0x5b8] sm:$0xff] }
 0xdc4   :  { %2016 = vmatprep.subr.bf16.mxu1 %v2196_v10  ;;  %v1467_v18 = vpack.c.bf16 %v1350_v15, %v1348_v14  ;;  %v1418_v54 = vld [vmem:[#allocation5 + $0x5a0] sm:$0xff]  ;;  %v1368_v15 = vld [vmem:[#allocation5 + $0x410] sm:$0xff] }
 0xdc6   :  { %1548 = vmatpush1.bf16.msra.mxu0 %v1455_v20  ;;  %v1354_v20 = vld [vmem:[#allocation5 + $0x3a0] sm:$0xff] }
 0xdc7   :  { %2017 = vmatpush3.bf16.msra.mxu1 %v1206_v24  ;;  %1549 = vmatprep.subr.bf16.mxu0 %v1458_v43  ;;  %v1403_v24 = vld [vmem:[#allocation5 + $0x528] sm:$0xff]  ;;  %v1402_v43 = vld [vmem:[#allocation5 + $0x520] sm:$0xff]  ;;  %v1469_v29 = vpack.c.bf16 %v1354_v20, %v1352_v19 }
 0xdc8   :  { %v1494_v27 = vpack.c.bf16 %v1403_v24, %v1401_v23  ;;  %v1375_v19 = vld [vmem:[#allocation5 + $0x448] sm:$0xff]  ;;  %v1477_v23 = vpack.c.bf16 %v1370_v16, %v1368_v15 }
 0xdc9   :  { %v1480_v24 = vpack.c.bf16 %v1375_v19, %v1373_v17 }
 0xdca   :  { %1550 = vmatpush1.bf16.msra.mxu0 %v1457_v28  ;;  %v1493_v28 = vpack.c.bf16 %v1402_v43, %v1400_v45  ;;  %1603 = vmatprep.subr.bf16.mxu1 %v1494_v27  ;;  %v1374_v27 = vld [vmem:[#allocation5 + $0x440] sm:$0xff]  ;;  %v1377_v43 = vld [vmem:[#allocation5 + $0x458] sm:$0xff] }
 0xdcb   :  { %1551 = vmatprep.subr.bf16.mxu0 %v1460_v31  ;;  %v1407_v31 = vld [vmem:[#allocation5 + $0x548] sm:$0xff] }
 0xdce   :  { %1552 = vmatpush1.bf16.msra.mxu0 %v1459_v34  ;;  %v1356_v34 = vld [vmem:[#allocation5 + $0x3b0] sm:$0xff] }
 0xdcf   :  { %1562 = vmatprep.subr.bf16.mxu0 %v1462_v56  ;;  %v1500_v56 = vpack.c.bf16 %v1415_v53, %v1413_v52  ;;  %v1395_v52 = vld [vmem:[#allocation5 + $0x4e8] sm:$0xff] }
 0xe7d   :  { %v2000_v10 = vpop.f32.mrb[36].mxu1 }
 0xe7e   :  { %1172 = vrot.lane.b32.xlu1 %v2000_v10, %s2199_s19  ;;  %v1152_v35 = vpop.f32.mrb[37].mxu1  ;;  %v1358_v10 = vld [vmem:[#allocation5 + $0x3c0] sm:$0xff] }
 0xe7f   :  { %v2001_v36 = vpop.f32.mrb[38].mxu1 }
 0xe80   :  { %v1155_v37 = vpop.f32.mrb[39].mxu1 }
 0xe81   :  { %1168 = vrot.lane.b32.xlu0 %v1155_v37, %s2198_s0  ;;  %v1361_v37 = vld [vmem:[#allocation5 + $0x3d8] sm:$0xff] }
 0xe82   :  { %1253 = vrot.lane.b32.xlu1 %v2408_v6, %s2200_s20 }
 0xe85   :  { %1176 = vrot.lane.b32.xlu0 %v2001_v36, %s2200_s20  ;;  %v1406_v36 = vld [vmem:[#allocation5 + $0x540] sm:$0xff] }
 0xe89   :  { %1257 = vrot.lane.b32.xlu0 %v1250_v38, %s2199_s19  ;;  %v1363_v38 = vld [vmem:[#allocation5 + $0x3e8] sm:$0xff] }
 0xe8d   :  { %1261 = vrot.lane.b32.xlu0 %v2414_v2, %s2198_s0 }
 0xef0   :  { %v1173_v39 = vpop.permute.xlu1 %1172 }
 0xef3   :  { %v1169_v40 = vpop.permute.xlu0 %1168 }
 0xef4   :  { %v1179_v41 = vsel %vm198_vm7, %v1152_v35, %v1169_v40  ;;  %v1254_v46 = vpop.permute.xlu1 %1253  ;;  %v1496_v35 = vpack.c.bf16 %v1407_v31, %v1405_v30  ;;  %v1409_v40 = vld [vmem:[#allocation5 + $0x558] sm:$0xff]  ;;  %v1376_v31 = vld [vmem:[#allocation5 + $0x450] sm:$0xff] }
 0xef5   :  { %v1180_v42 = vsel %vm582_vm12, %v1179_v41, %v1173_v39  ;;  %v1268_v6 = vsel %vm585_vm13, %v2406_v4, %v1254_v46  ;;  %v1461_v4 = vpack.c.bf16 %v1338_v58, %v1336_v55  ;;  %v1495_v39 = vpack.c.bf16 %v1406_v36, %v1404_v32  ;;  %v1411_v41 = vld [vmem:[#allocation5 + $0x568] sm:$0xff]  ;;  %v1412_v58 = vld [vmem:[#allocation5 + $0x570] sm:$0xff]  ;;  %v1378_v32 = vld [vmem:[#allocation5 + $0x460] sm:$0xff] }
 0xef6   :  { %v1424_v50 = vpack.c.bf16 %v1268_v6, %v1268_v6  ;;  %v1498_v6 = vpack.c.bf16 %v1411_v41, %v1409_v40  ;;  %v1367_v55 = vld [vmem:[#allocation5 + $0x408] sm:$0xff]  ;;  %v1380_v36 = vld [vmem:[#allocation5 + $0x470] sm:$0xff] }
 0xef7   :  { %v1177_v44 = vpop.permute.xlu0 %1176 }
 0xef8   :  { %v1181_v47 = vsel %vm585_vm13, %v1180_v42, %v1177_v44  ;;  %v1408_v42 = vld [vmem:[#allocation5 + $0x550] sm:$0xff]  ;;  %v1410_v44 = vld [vmem:[#allocation5 + $0x560] sm:$0xff] }
 0xef9   :  { %v1198_v48 = vpack.c.bf16 %v1181_v47, %v1181_v47  ;;  %v1360_v47 = vld [vmem:[#allocation5 + $0x3d0] sm:$0xff] }
 0xefb   :  { %2019 = vmatmul.mubr.bf16.vlgmr.msra.gmra.mrb[40].mxu1 %v1198_v48  ;;  %v2447_v7 = vpop.permute.xlu0 %1257  ;;  %v1362_v48 = vld [vmem:[#allocation5 + $0x3e0] sm:$0xff] }
 0xefc   :  { %v1269_v2 = vsel %vm582_vm12, %v1254_v46, %v2447_v7  ;;  %1635 = vmatprep.mubr.bf16.mxu1 %v2194_v1  ;;  %1604 = vmatpush1.bf16.msra.mxu1 %v1493_v28  ;;  %v1471_v46 = vpack.c.bf16 %v1358_v10, %v1356_v34  ;;  %v1473_v60 = vpack.c.bf16 %v1362_v48, %v1360_v47  ;;  %v1379_v28 = vld [vmem:[#allocation5 + $0x468] sm:$0xff] }
 0xefd   :  { %v1425_v49 = vpack.c.bf16 %v1269_v2, %v1269_v2  ;;  %1605 = vmatprep.subr.bf16.mxu1 %v1496_v35  ;;  %v1474_v2 = vpack.c.bf16 %v1363_v38, %v1361_v37  ;;  %v1482_v30 = vpack.c.bf16 %v1379_v28, %v1377_v43  ;;  %v1383_v34 = vld [vmem:[#allocation5 + $0x488] sm:$0xff]  ;;  %v1481_v10 = vpack.c.bf16 %v1378_v32, %v1376_v31  ;;  %v1382_v37 = vld [vmem:[#allocation5 + $0x480] sm:$0xff]  ;;  %v1385_v38 = vld [vmem:[#allocation5 + $0x498] sm:$0xff] }
 0xefe   :  { %v1483_v40 = vpack.c.bf16 %v1382_v37, %v1380_v36  ;;  %v1391_v47 = vld [vmem:[#allocation5 + $0x4c8] sm:$0xff]  ;;  %v1654_v28 = vld [vmem:[#allocation5 + $0x660] sm:$0xff]  ;;  %v1657_v32 = vld [vmem:[#allocation5 + $0x690] sm:$0xff] }
 0xeff   :  { %1553 = vmatprep.mubr.bf16.mxu0 %v1425_v49  ;;  %v1365_v49 = vld [vmem:[#allocation5 + $0x3f8] sm:$0xff]  ;;  %v1656_v31 = vld [vmem:[#allocation5 + $0x680] sm:$0xff]  ;;  %v1661_v37 = vld [vmem:[#allocation5 + $0x6d0] sm:$0xff] }
 0xf00   :  { %1554 = vmatmul.mubr.bf16.vlgmr.msra.gmra.mrb[32].mxu0 %v1424_v50  ;;  %1606 = vmatpush1.bf16.msra.mxu1 %v1495_v39  ;;  %v1497_v50 = vpack.c.bf16 %v1410_v44, %v1408_v42  ;;  %v1476_v62 = vpack.c.bf16 %v1367_v55, %v1365_v49  ;;  %v1387_v39 = vld [vmem:[#allocation5 + $0x4a8] sm:$0xff]  ;;  %v1384_v42 = vld [vmem:[#allocation5 + $0x490] sm:$0xff]  ;;  %v1386_v44 = vld [vmem:[#allocation5 + $0x4a0] sm:$0xff] }
 0xf01   :  { %1563 = vmatpush1.bf16.msra.mxu0 %v1461_v4  ;;  %1607 = vmatprep.subr.bf16.mxu1 %v1498_v6  ;;  %v1417_v4 = vld [vmem:[#allocation5 + $0x598] sm:$0xff]  ;;  %v1486_v41 = vpack.c.bf16 %v1387_v39, %v1385_v38  ;;  %v1485_v48 = vpack.c.bf16 %v1386_v44, %v1384_v42  ;;  %v1390_v49 = vld [vmem:[#allocation5 + $0x4c0] sm:$0xff]  ;;  %v1665_v44 = vld [vmem:[#allocation5 + $0x710] sm:$0xff] }
 0xf02   :  { %1564 = vmatprep.subr.bf16.mxu0 %v1464_v61  ;;  %v1419_v61 = vld [vmem:[#allocation5 + $0x5a8] sm:$0xff]  ;;  %v1660_v36 = vld [vmem:[#allocation5 + $0x6c0] sm:$0xff] }
 0xf03   :  { %v1502_v9 = vpack.c.bf16 %v1419_v61, %v1417_v4  ;;  %v1399_v4 = vld [vmem:[#allocation5 + $0x508] sm:$0xff]  ;;  %v1679_v38 = vpack.c.bf16 %v1661_v37, %v1660_v36  ;;  %v1662_v39 = vld [vmem:[#allocation5 + $0x6e0] sm:$0xff] }
 0xf04   :  { %1608 = vmatpush1.bf16.msra.mxu1 %v1497_v50  ;;  %v1393_v50 = vld [vmem:[#allocation5 + $0x4d8] sm:$0xff]  ;;  %v1664_v42 = vld [vmem:[#allocation5 + $0x700] sm:$0xff] }
 0xf05   :  { %1565 = vmatpush1.bf16.msra.mxu0 %v1463_v51  ;;  %v1499_v51 = vpack.c.bf16 %v1414_v59, %v1412_v58  ;;  %1609 = vmatprep.subr.bf16.mxu1 %v1500_v56  ;;  %v1490_v55 = vpack.c.bf16 %v1395_v52, %v1393_v50  ;;  %v1392_v56 = vld [vmem:[#allocation5 + $0x4d0] sm:$0xff]  ;;  %v1394_v58 = vld [vmem:[#allocation5 + $0x4e0] sm:$0xff]  ;;  %v1509_v52 = vshrl.u32 %v48_v25, 7 }
 0xf06   :  { %1566 = vmatprep.subr.bf16.mxu0 %v1466_v0  ;;  %v1371_v0 = vld [vmem:[#allocation5 + $0x428] sm:$0xff]  ;;  %v1489_v59 = vpack.c.bf16 %v1394_v58, %v1392_v56 }
 0xf07   :  { %v1478_v14 = vpack.c.bf16 %v1371_v0, %v1369_v8  ;;  %v1207_v8 = vld [vmem:[#allocation5 + $0x100] ss:$0 sm:$0xff]  ;;  %v1514_v56 = vsub.s32 1, %v1509_v52 }
 0xf08   :  { %1610 = vmatpush1.bf16.msra.mxu1 %v1499_v51 }
 0xf09   :  { %1567 = vmatpush1.bf16.msra.mxu0 %v1465_v57  ;;  %v1423_v57 = vld [vmem:[#allocation5 + $0x5c8] sm:$0xff]  ;;  %1611 = vmatprep.subr.bf16.mxu1 %v1502_v9 }
 0xf0a   :  { %1568 = vmatprep.subr.bf16.mxu0 %v1468_v13  ;;  %v1475_v13 = vpack.c.bf16 %v1366_v5, %v1364_v63  ;;  %v1504_v20 = vpack.c.bf16 %v1423_v57, %v1421_v12  ;;  %v1398_v63 = vld [vmem:[#allocation5 + $0x500] sm:$0xff]  ;;  %v1262_v57 = vpop.permute.xlu0 %1261 }
 0xf0b   :  { %v1270_v15 = vsel %vm198_vm7, %v2447_v7, %v1262_v57  ;;  %v1651_v7 = vld [vmem:[#allocation5 + $0x630] sm:$0xff] }
 0xf0d   :  { %1569 = vmatpush1.bf16.msra.mxu0 %v1467_v18  ;;  %v1501_v18 = vpack.c.bf16 %v1418_v54, %v1416_v11 }
 0xf0e   :  { %1570 = vmatprep.subr.bf16.mxu0 %v1470_v21  ;;  %v1420_v21 = vld [vmem:[#allocation5 + $0x5b0] sm:$0xff] }
 0xf0f   :  { %1612 = vmatpush1.bf16.msra.mxu1 %v1501_v18  ;;  %v1503_v45 = vpack.c.bf16 %v1422_v22, %v1420_v21  ;;  %v1649_v21 = vld [vmem:[#allocation5 + $0x610] sm:$0xff] }
 0xf10   :  { %1613 = vmatprep.subr.bf16.mxu1 %v1504_v20  ;;  %v1648_v20 = vld [vmem:[#allocation5 + $0x600] sm:$0xff] }
 0xf11   :  { %1571 = vmatpush1.bf16.msra.mxu0 %v1469_v29  ;;  %v1479_v29 = vpack.c.bf16 %v1374_v27, %v1372_v26  ;;  %v1650_v26 = vld [vmem:[#allocation5 + $0x620] sm:$0xff] }
 0xf12   :  { %1572 = vmatprep.subr.bf16.mxu0 %v1472_v33  ;;  %v1381_v33 = vld [vmem:[#allocation5 + $0x478] sm:$0xff]  ;;  %v1674_v27 = vpack.c.bf16 %v1651_v7, %v1650_v26 }
 0xf13   :  { %1614 = vmatpush1.bf16.msra.mxu1 %v1503_v45  ;;  %v1484_v35 = vpack.c.bf16 %v1383_v34, %v1381_v33  ;;  %v1653_v45 = vld [vmem:[#allocation5 + $0x650] sm:$0xff]  ;;  %v1677_v33 = vpack.c.bf16 %v1657_v32, %v1656_v31  ;;  %v1658_v34 = vld [vmem:[#allocation5 + $0x6a0] sm:$0xff] }
 0xf14   :  { %1688 = vmatprep.subr.bf16.mxu1 %v2194_v1 }
 0xf15   :  { %1573 = vmatpush1.bf16.msra.mxu0 %v1471_v46  ;;  %v1389_v46 = vld [vmem:[#allocation5 + $0x4b8] sm:$0xff] }
 0xf16   :  { %1574 = vmatprep.subr.bf16.mxu0 %v1474_v2  ;;  %v1488_v6 = vpack.c.bf16 %v1391_v47, %v1389_v46  ;;  %v1388_v2 = vld [vmem:[#allocation5 + $0x4b0] sm:$0xff]  ;;  %v1681_v46 = vpack.c.bf16 %v1665_v44, %v1664_v42  ;;  %v1666_v47 = vld [vmem:[#allocation5 + $0x720] sm:$0xff] }
 0xf17   :  { %v1487_v53 = vpack.c.bf16 %v1390_v49, %v1388_v2  ;;  %v1668_v2 = vld [vmem:[#allocation5 + $0x740] sm:$0xff]  ;;  %v1669_v49 = vld [vmem:[#allocation5 + $0x750] sm:$0xff] }
 0xf18   :  { %v1683_v50 = vpack.c.bf16 %v1669_v49, %v1668_v2 }
 0xf19   :  { %1575 = vmatpush1.bf16.msra.mxu0 %v1473_v60  ;;  %v1397_v60 = vld [vmem:[#allocation5 + $0x4f8] sm:$0xff] }
 0xf1a   :  { %1576 = vmatprep.subr.bf16.mxu0 %v1476_v62  ;;  %v1492_v61 = vpack.c.bf16 %v1399_v4, %v1397_v60  ;;  %v1396_v62 = vld [vmem:[#allocation5 + $0x4f0] sm:$0xff] }
 0xf1b   :  { %v1491_v5 = vpack.c.bf16 %v1398_v63, %v1396_v62 }
 0xf1d   :  { %1577 = vmatpush1.bf16.msra.mxu0 %v1475_v13  ;;  %v1646_v13 = vld [vmem:[#allocation5 + $0x5e0] sm:$0xff] }
 0xf1e   :  { %1578 = vmatprep.subr.bf16.mxu0 %v1478_v14  ;;  %v1647_v14 = vld [vmem:[#allocation5 + $0x5f0] sm:$0xff] }
 0xf1f   :  { %v1672_v17 = vpack.c.bf16 %v1647_v14, %v1646_v13  ;;  %v1684_v13 = vld [vmem:[#allocation5 + $0x760] ss:$0 sm:$0xff] }
 0xf21   :  { %1579 = vmatpush1.bf16.msra.mxu0 %v1477_v23  ;;  %v1426_v23 = vpack.c.bf16 %v1270_v15, %v1270_v15 }
 0xf22   :  { %1580 = vmatprep.subr.bf16.mxu0 %v1480_v24  ;;  %v1673_v24 = vpack.c.bf16 %v1649_v21, %v1648_v20 }
 0xf25   :  { %1581 = vmatpush1.bf16.msra.mxu0 %v1479_v29  ;;  %v1655_v29 = vld [vmem:[#allocation5 + $0x670] sm:$0xff] }
 0xf26   :  { %1582 = vmatprep.subr.bf16.mxu0 %v1482_v30  ;;  %v1676_v30 = vpack.c.bf16 %v1655_v29, %v1654_v28 }
 0xf29   :  { %1583 = vmatpush1.bf16.msra.mxu0 %v1481_v10  ;;  %v1659_v10 = vld [vmem:[#allocation5 + $0x6b0] sm:$0xff] }
 0xf2a   :  { %1584 = vmatprep.subr.bf16.mxu0 %v1484_v35  ;;  %v1678_v35 = vpack.c.bf16 %v1659_v10, %v1658_v34 }
 0xf2d   :  { %1585 = vmatpush1.bf16.msra.mxu0 %v1483_v40  ;;  %v1663_v40 = vld [vmem:[#allocation5 + $0x6f0] sm:$0xff] }
 0xf2e   :  { %1586 = vmatprep.subr.bf16.mxu0 %v1486_v41  ;;  %v1680_v41 = vpack.c.bf16 %v1663_v40, %v1662_v39 }
 0xf31   :  { %1587 = vmatpush1.bf16.msra.mxu0 %v1485_v48  ;;  %v1667_v48 = vld [vmem:[#allocation5 + $0x730] sm:$0xff] }
 0xf32   :  { %1588 = vmatprep.subr.bf16.mxu0 %v1488_v6  ;;  %v1682_v6 = vpack.c.bf16 %v1667_v48, %v1666_v47 }
 0xf35   :  { %1589 = vmatpush1.bf16.msra.mxu0 %v1487_v53  ;;  %v1510_v53 = vsub.s32 0, %v1509_v52 }
 0xf36   :  { %1590 = vmatprep.subr.bf16.mxu0 %v1490_v55  ;;  %v1506_v55 = vld [vmem:[#allocation5 + $0x5d0] ss:$8 sm:$0x3] }
 0xf37   :  { %v1511_v58 = vrot.slane %v1506_v55, %v1510_v53  ;;  %v1515_v60 = vrot.slane %v1506_v55, %v1514_v56 }
 0xf39   :  { %1591 = vmatpush1.bf16.msra.mxu0 %v1489_v59 }
 0xf3a   :  { %1592 = vmatprep.subr.bf16.mxu0 %v1492_v61 }
 0xf3d   :  { %1593 = vmatpush1.bf16.msra.mxu0 %v1491_v5 }
 0xfce   :  { %v1242_v51 = vpop.f32.mrb[40].mxu1 }
 0xfcf   :  { %v1243_v0 = vadd.f32 %v1242_v51, %v1207_v8  ;;  %v2020_v9 = vpop.f32.mrb[41].mxu1 }
 0xfd0   :  { %v1245_v11 = vpop.f32.mrb[42].mxu1 }
 0xfd1   :  { %v1248_v54 = vmax.f32 %v1243_v0, 0.0  ;;  %v2021_v12 = vpop.f32.mrb[43].mxu1 }
 0xfd3   :  { %1265 = vrot.lane.b32.xlu1 %v1248_v54, %s2200_s20 }
0x1045   :  { %v1266_v16 = vpop.permute.xlu1 %1265 }
0x1046   :  { %v1271_v18 = vsel %vm585_vm13, %v2404_v3, %v1266_v16  ;;  %v1428_v19 = vpack.c.bf16 %v1266_v16, %v1266_v16  ;;  %v1652_v3 = vld [vmem:[#allocation5 + $0x640] sm:$0xff] }
0x1047   :  { %v1427_v22 = vpack.c.bf16 %v1271_v18, %v1271_v18  ;;  %v1675_v43 = vpack.c.bf16 %v1653_v45, %v1652_v3 }
0x1048   :  { %1777 = vmatmul.mubr.msk.bf16.vlgmr.msra.gmra.mrb[44].mxu1 %vm585_vm13, %v1428_v19 }
0x1049   :  { %1594 = vmatprep.mubr.bf16.mxu0 %v1427_v22  ;;  %1689 = vmatpush1.bf16.msra.mxu1 %v1672_v17 }
0x104a   :  { %1595 = vmatmul.mubr.bf16.vlgmr.msra.gmra.mrb[32].mxu0 %v1426_v23  ;;  %1690 = vmatprep.subr.bf16.mxu1 %v2194_v1 }
0x104d   :  { %1691 = vmatpush1.bf16.msra.mxu1 %v1673_v24 }
0x104e   :  { %1692 = vmatprep.subr.bf16.mxu1 %v2194_v1 }
0x1051   :  { %1693 = vmatpush1.bf16.msra.mxu1 %v1674_v27 }
0x1052   :  { %1694 = vmatprep.subr.bf16.mxu1 %v2194_v1 }
0x1055   :  { %1695 = vmatpush1.bf16.msra.mxu1 %v1675_v43 }
0x1056   :  { %1696 = vmatprep.subr.bf16.mxu1 %v2194_v1 }
0x1059   :  { %1697 = vmatpush1.bf16.msra.mxu1 %v1676_v30 }
0x105a   :  { %1698 = vmatprep.subr.bf16.mxu1 %v2194_v1 }
0x105d   :  { %1699 = vmatpush1.bf16.msra.mxu1 %v1677_v33 }
0x105e   :  { %1700 = vmatprep.subr.bf16.mxu1 %v2194_v1 }
0x1061   :  { %1701 = vmatpush1.bf16.msra.mxu1 %v1678_v35 }
0x1062   :  { %1702 = vmatprep.subr.bf16.mxu1 %v2194_v1 }
0x1065   :  { %1703 = vmatpush1.bf16.msra.mxu1 %v1679_v38 }
0x1066   :  { %1704 = vmatprep.subr.bf16.mxu1 %v2194_v1 }
0x1069   :  { %1705 = vmatpush1.bf16.msra.mxu1 %v1680_v41 }
0x106a   :  { %1706 = vmatprep.subr.bf16.mxu1 %v2194_v1 }
0x106d   :  { %1707 = vmatpush1.bf16.msra.mxu1 %v1681_v46 }
0x106e   :  { %1708 = vmatprep.subr.bf16.mxu1 %v2194_v1 }
0x1071   :  { %1709 = vmatpush1.bf16.msra.mxu1 %v1682_v6 }
0x1072   :  { %1710 = vmatprep.subr.bf16.mxu1 %v2194_v1 }
0x1075   :  { %1711 = vmatpush1.bf16.msra.mxu1 %v1683_v50 }
0x111b   :  { %v1637_v59 = vpop.f32.mrb[44].mxu1 }
0x111c   :  { %v1639_v4 = vpop.f32.mrb[45].mxu1 }
0x111d   :  { %v1596_v61 = vpop.f32.mrb[32].mxu0  ;;  %v1641_v62 = vpop.f32.mrb[46].mxu1 }
0x111e   :  { %v2022_v63 = vadd.f32 %v1596_v61, %v1511_v58  ;;  %v1598_v5 = vpop.f32.mrb[33].mxu0  ;;  %v1642_v8 = vpop.f32.mrb[47].mxu1 }
0x111f   :  { %v2024_v51 = vadd.f32 %v1598_v5, %v1515_v60  ;;  %v1600_v1 = vpop.f32.mrb[34].mxu0 }
0x1120   :  { %v2023_v0 = vadd.f32 %v2022_v63, %v1637_v59  ;;  %v1601_v9 = vpop.f32.mrb[35].mxu0 }
0x1121   :  { %v2025_v11 = vadd.f32 %v2024_v51, %v1639_v4 }
0x1122   :  { %v1644_v54 = vmax.f32 %v2023_v0, 0.0 }
0x1123   :  { %v1645_v12 = vmax.f32 %v2025_v11, 0.0 }
0x1124   :  { %v1670_v57 = vpack.c.bf16 %v1644_v54, %v1644_v54 }
0x1125   :  { %v1671_v25 = vpack.c.bf16 %v1645_v12, %v1645_v12 }
0x1127   :  { %1778 = vmatprep.mubr.msk.bf16.mxu1 %vm582_vm12, %v1671_v25 }
0x1128   :  { %1721 = vmatmul.mubr.bf16.vlgmr.msra.gmra.mrb[48].mxu1 %v1670_v57 }
0x11fb   :  { %v1722_v14 = vpop.f32.mrb[48].mxu1 }
0x11fc   :  { %v1723_v15 = vadd.f32 %v1722_v14, %v1684_v13  ;;  %v1724_v16 = vpop.f32.mrb[49].mxu1 }
0x11fd   :  { %v1725_v17 = vpop.f32.mrb[50].mxu1 }
0x11fe   :  { %1728 = vst [vmem:[#allocation7] sm:$0xff] %v1723_v15  ;;  %v1726_v18 = vpop.f32.mrb[51].mxu1 }
0x11ff   :  { %2170 = shalt.err (!%p2167_p6)
}
0x1200   :  { %s2171_s26 = scalar_lea.hbm %s2487_s3, 128 }
0x1201   :  { %p2172_p7 = scmp.ne.s32.totalorder %s2487_s3, %s2171_s26  ;;  %p2175_p8 = scmp.lt.u32.totalorder %s2171_s26, %s2487_s3 }
0x1203   :  { %p2177_p9 = pnand %p2175_p8, %p2172_p7 }
0x1205   :  { %2180 = shalt.err (!%p2177_p9)
}
0x1206   :  { %1738 = dma.vmem_to_hbm [thread:$0]  %s1736_s22, 128, %s2487_s3, [#allocation4]  }
0x1207   :  { %2185 = dma.done.wait [#allocation4], 128  }
0x1208   :  { %2186 = vsyncadd [#allocation4], 4294967168 }
0x1209   :  { %1742 = vsyncpa [#allocation3], 1 }
0x120a   :  { %1743 = vsyncpa [#allocation6], 1 }
0x120b   :  { %1744 = vsyncpa [#allocation4], 1 }

</bundles_post_ra>
